<compile_context>
chip_gen: v5e
topology: v5e:2x2
jax: 0.10.0
libtpu: 0.0.40
codegen_flags: <defaults>
</compile_context>

<pallas_src>
import functools

import jax
import jax.numpy as jnp
from jax.experimental import pallas as pl
from jax.experimental.pallas import tpu as pltpu

IN_DIM = 3
HIDDEN_DIM = 16
OUT_DIM = 1
NUM_LAYERS = 4
LN_EPS = 1e-5


def _gcn_fused_kernel(a_ref, x_ref, w_ref, v_ref, o_ref, *, eps):
    """Fused 4-layer GCN forward.

    a_ref: [N, N]          GCN-normalized dense adjacency
    x_ref: [N, HID]        input node features, zero-padded from IN_DIM to HID lanes
    w_ref: [4, HID, HID]   packed weights (W0 zero-padded rows, W3 zero-padded cols)
    v_ref: [12, HID]       packed vectors; rows 3l+0/1/2 = bias/gamma/beta of layer l
    o_ref: [N, HID]        final activations; only column 0 is the GCN output
    """
    a = a_ref[...]
    h = x_ref[...]

    def ln_relu(h, l):
        gamma = v_ref[3 * l + 1:3 * l + 2, :]            # [1, HID]
        beta = v_ref[3 * l + 2:3 * l + 3, :]             # [1, HID]
        mean = jnp.mean(h, axis=-1, keepdims=True)
        diff = h - mean
        var = jnp.mean(diff * diff, axis=-1, keepdims=True)  # two-pass variance
        hn = diff * jax.lax.rsqrt(var + eps)
        return jnp.maximum(hn * gamma + beta, 0.0)        # LN scale/shift + ReLU

    # All layers uniform: h <- A @ (h @ W_l) + b_l ; LN + ReLU except last.
    for l in range(NUM_LAYERS):
        hw = jnp.dot(h, w_ref[l], preferred_element_type=jnp.float32)     # [N, HID]
        h = jnp.dot(a, hw, preferred_element_type=jnp.float32)            # [N, HID]
        h = h + v_ref[3 * l:3 * l + 1, :]
        if l < NUM_LAYERS - 1:
            h = ln_relu(h, l)

    o_ref[...] = h.astype(o_ref.dtype)


def pack_params(params):
    """Pack per-layer (w, b, gamma, beta) into two VMEM-friendly slabs (done once)."""
    w_slab = jnp.zeros((NUM_LAYERS, HIDDEN_DIM, HIDDEN_DIM), jnp.float32)
    v_slab = jnp.zeros((3 * NUM_LAYERS, HIDDEN_DIM), jnp.float32)
    for l, (w, b, gamma, beta) in enumerate(params):
        din, dout = w.shape
        w_slab = w_slab.at[l, :din, :dout].set(w)
        v_slab = v_slab.at[3 * l + 0, :dout].set(b.reshape(-1))
        v_slab = v_slab.at[3 * l + 1, :dout].set(gamma.reshape(-1))
        v_slab = v_slab.at[3 * l + 2, :dout].set(beta.reshape(-1))
    return w_slab, v_slab


def pad_features(x):
    """Zero-pad [N, IN_DIM] node features to [N, HIDDEN_DIM] (done once)."""
    n, f = x.shape
    return jnp.zeros((n, HIDDEN_DIM), jnp.float32).at[:, :f].set(x)


def build_gcn_norm_adj(edge_index, num_nodes):
    """Dense D^-1/2 (A + I) D^-1/2, matching PyG gcn_norm (in-degree, src->dst). Done once."""
    src = edge_index[0]
    dst = edge_index[1]
    loop = jnp.arange(num_nodes, dtype=src.dtype)
    src = jnp.concatenate([src, loop])
    dst = jnp.concatenate([dst, loop])
    deg = jnp.zeros((num_nodes,), jnp.float32).at[dst].add(1.0)
    dinv = jnp.where(deg > 0, 1.0 / jnp.sqrt(deg), 0.0)
    w = dinv[src] * dinv[dst]
    a = jnp.zeros((num_nodes, num_nodes), jnp.float32).at[dst, src].add(w)
    return a


@jax.jit
def gcn_forward(a_hat, x_pad, w_slab, v_slab):
    """Jitted forward: one fused Pallas call + static column-0 slice."""
    n = a_hat.shape[0]
    flops = 2 * NUM_LAYERS * (n * HIDDEN_DIM * HIDDEN_DIM + n * n * HIDDEN_DIM)
    bytes_accessed = 4 * (n * n + 2 * n * HIDDEN_DIM + w_slab.size + v_slab.size)
    kernel = functools.partial(_gcn_fused_kernel, eps=LN_EPS)
    vmem_spec = pl.BlockSpec(memory_space=pltpu.MemorySpace.VMEM)
    out = pl.pallas_call(
        kernel,
        out_shape=jax.ShapeDtypeStruct((n, HIDDEN_DIM), jnp.float32),
        in_specs=[vmem_spec] * 4,
        out_specs=vmem_spec,
        cost_estimate=pl.CostEstimate(
            flops=flops, transcendentals=(NUM_LAYERS - 1) * n,
            bytes_accessed=bytes_accessed),
    )(a_hat, x_pad, w_slab, v_slab)
    return out[:, :OUT_DIM]                               # [N, 1]


def init_params(key):
    """Deterministic glorot-uniform weights, zero biases, LN gamma=1 beta=0."""
    dims = [(IN_DIM, HIDDEN_DIM), (HIDDEN_DIM, HIDDEN_DIM),
            (HIDDEN_DIM, HIDDEN_DIM), (HIDDEN_DIM, OUT_DIM)]
    params = []
    for i, (din, dout) in enumerate(dims):
        k = jax.random.fold_in(key, i)
        limit = (6.0 / (din + dout)) ** 0.5
        w = jax.random.uniform(k, (din, dout), jnp.float32, -limit, limit)
        b = jnp.zeros((1, dout), jnp.float32)
        gamma = jnp.ones((1, dout), jnp.float32)   # unused for the last layer
        beta = jnp.zeros((1, dout), jnp.float32)   # unused for the last layer
        params.append((w, b, gamma, beta))
    return params


def _reference_forward(x, edge_index, params):
    """Pure-JAX reference (highest matmul precision) for a correctness check."""
    a_hat = build_gcn_norm_adj(edge_index, x.shape[0])
    hp = jax.lax.Precision.HIGHEST
    h = x
    for li, (w, b, gamma, beta) in enumerate(params):
        h = jnp.dot(a_hat, jnp.dot(h, w, precision=hp), precision=hp) + b
        if li < len(params) - 1:
            mean = jnp.mean(h, axis=-1, keepdims=True)
            var = jnp.mean((h - mean) ** 2, axis=-1, keepdims=True)
            h = (h - mean) / jnp.sqrt(var + LN_EPS) * gamma + beta
            h = jnp.maximum(h, 0.0)
    return h


if __name__ == "__main__":
    key = jax.random.PRNGKey(0)
    N = 64           # number of graph nodes
    E = 128          # number of (directed) random edges

    kx, ke, km, kp = jax.random.split(key, 4)
    x = jax.random.normal(kx, (N, IN_DIM), jnp.float32)

    # random undirected edges (both directions), deterministic
    src = jax.random.randint(ke, (E,), 0, N, dtype=jnp.int32)
    dst = jax.random.randint(jax.random.fold_in(ke, 1), (E,), 0, N, dtype=jnp.int32)
    edge_index = jnp.stack([jnp.concatenate([src, dst]),
                            jnp.concatenate([dst, src])], axis=0)  # [2, 2E]

    decision_variable_mask = jax.random.bernoulli(km, 0.5, (N,))

    params = init_params(kp)

    # ---- one-time preprocessing, hoisted out of the forward path ----
    a_hat = build_gcn_norm_adj(edge_index, N)       # static graph -> build once
    w_slab, v_slab = pack_params(params)            # pack once
    x_pad = pad_features(x)                         # pad once

    # ---- jitted fused forward ----
    out_all = gcn_forward(a_hat, x_pad, w_slab, v_slab)   # [N, 1]
    out_all = jax.block_until_ready(out_all)

    # correctness check vs pure-JAX reference
    ref = jax.block_until_ready(_reference_forward(x, edge_index, params))
    assert out_all.shape == (N, OUT_DIM)
    assert jnp.max(jnp.abs(out_all - ref)) < 2e-3

    # final masked gather (dynamic shape) done in plain JAX glue OUTSIDE jit, like x[mask]
    out = out_all[decision_variable_mask]
    assert out.shape[0] == int(decision_variable_mask.sum())
    print("KERNEL_OK")
</pallas_src>

<mosaic_0001>
module attributes {stable_mosaic.version = 11 : i64} {
  func.func @_gcn_fused_kernel(%arg0: memref<64x64xf32, #tpu.memory_space<vmem>>, %arg1: memref<64x16xf32, #tpu.memory_space<vmem>>, %arg2: memref<4x16x16xf32, #tpu.memory_space<vmem>>, %arg3: memref<12x16xf32, #tpu.memory_space<vmem>>, %arg4: memref<64x16xf32, #tpu.memory_space<vmem>>) attributes {dimension_semantics = [], scalar_prefetch = 0 : i64, scratch_operands = 0 : i64, tpu.core_type = #tpu.core_type<tc>} {
    %c0 = arith.constant 0 : index
    %c0_0 = arith.constant 0 : index
    %0 = vector.load %arg0[%c0, %c0_0] : memref<64x64xf32, #tpu.memory_space<vmem>>, vector<64x64xf32>
    %c0_1 = arith.constant 0 : index
    %c0_2 = arith.constant 0 : index
    %1 = vector.load %arg1[%c0_1, %c0_2] : memref<64x16xf32, #tpu.memory_space<vmem>>, vector<64x16xf32>
    %c0_3 = arith.constant 0 : index
    %c0_4 = arith.constant 0 : index
    %c0_5 = arith.constant 0 : index
    %2 = vector.load %arg2[%c0_3, %c0_4, %c0_5] : memref<4x16x16xf32, #tpu.memory_space<vmem>>, vector<1x16x16xf32>
    %3 = vector.shape_cast %2 : vector<1x16x16xf32> to vector<16x16xf32>
    %cst = arith.constant dense<0.000000e+00> : vector<64x16xf32>
    %4 = tpu.matmul %1, %3, %cst {dimension_numbers = #tpu.dot_dimension_numbers<[1], [0], [0], [1], [0, 0, 1, 1], [], []>} : vector<64x16xf32>, vector<16x16xf32>, vector<64x16xf32> -> vector<64x16xf32>
    %cst_6 = arith.constant dense<0.000000e+00> : vector<64x16xf32>
    %5 = tpu.matmul %0, %4, %cst_6 {dimension_numbers = #tpu.dot_dimension_numbers<[1], [0], [0], [1], [0, 0, 1, 1], [], []>} : vector<64x64xf32>, vector<64x16xf32>, vector<64x16xf32> -> vector<64x16xf32>
    %c0_7 = arith.constant 0 : index
    %c0_8 = arith.constant 0 : index
    %6 = vector.load %arg3[%c0_7, %c0_8] : memref<12x16xf32, #tpu.memory_space<vmem>>, vector<1x16xf32>
    %7 = vector.broadcast %6 : vector<1x16xf32> to vector<64x16xf32>
    %8 = arith.addf %5, %7 : vector<64x16xf32>
    %c1 = arith.constant 1 : index
    %c0_9 = arith.constant 0 : index
    %9 = vector.load %arg3[%c1, %c0_9] : memref<12x16xf32, #tpu.memory_space<vmem>>, vector<1x16xf32>
    %c2 = arith.constant 2 : index
    %c0_10 = arith.constant 0 : index
    %10 = vector.load %arg3[%c2, %c0_10] : memref<12x16xf32, #tpu.memory_space<vmem>>, vector<1x16xf32>
    %cst_11 = arith.constant dense<0.000000e+00> : vector<64xf32>
    %11 = vector.multi_reduction <add>, %8, %cst_11 [1] : vector<64x16xf32> to vector<64xf32>
    %12 = vector.shape_cast %11 : vector<64xf32> to vector<64x1xf32>
    %cst_12 = arith.constant 1.600000e+01 : f32
    %13 = vector.broadcast %cst_12 : f32 to vector<64x1xf32>
    %14 = arith.divf %12, %13 : vector<64x1xf32>
    %15 = vector.broadcast %14 : vector<64x1xf32> to vector<64x16xf32>
    %16 = arith.subf %8, %15 : vector<64x16xf32>
    %17 = arith.mulf %16, %16 : vector<64x16xf32>
    %cst_13 = arith.constant dense<0.000000e+00> : vector<64xf32>
    %18 = vector.multi_reduction <add>, %17, %cst_13 [1] : vector<64x16xf32> to vector<64xf32>
    %19 = vector.shape_cast %18 : vector<64xf32> to vector<64x1xf32>
    %cst_14 = arith.constant 1.600000e+01 : f32
    %20 = vector.broadcast %cst_14 : f32 to vector<64x1xf32>
    %21 = arith.divf %19, %20 : vector<64x1xf32>
    %cst_15 = arith.constant 9.99999974E-6 : f32
    %22 = vector.broadcast %cst_15 : f32 to vector<64x1xf32>
    %23 = arith.addf %21, %22 : vector<64x1xf32>
    %24 = math.rsqrt %23 : vector<64x1xf32>
    %25 = vector.broadcast %24 : vector<64x1xf32> to vector<64x16xf32>
    %26 = arith.mulf %16, %25 : vector<64x16xf32>
    %27 = vector.broadcast %9 : vector<1x16xf32> to vector<64x16xf32>
    %28 = arith.mulf %26, %27 : vector<64x16xf32>
    %29 = vector.broadcast %10 : vector<1x16xf32> to vector<64x16xf32>
    %30 = arith.addf %28, %29 : vector<64x16xf32>
    %cst_16 = arith.constant 0.000000e+00 : f32
    %31 = vector.broadcast %cst_16 : f32 to vector<64x16xf32>
    %32 = arith.maximumf %30, %31 : vector<64x16xf32>
    %c1_17 = arith.constant 1 : index
    %c0_18 = arith.constant 0 : index
    %c0_19 = arith.constant 0 : index
    %33 = vector.load %arg2[%c1_17, %c0_18, %c0_19] : memref<4x16x16xf32, #tpu.memory_space<vmem>>, vector<1x16x16xf32>
    %34 = vector.shape_cast %33 : vector<1x16x16xf32> to vector<16x16xf32>
    %cst_20 = arith.constant dense<0.000000e+00> : vector<64x16xf32>
    %35 = tpu.matmul %32, %34, %cst_20 {dimension_numbers = #tpu.dot_dimension_numbers<[1], [0], [0], [1], [0, 0, 1, 1], [], []>} : vector<64x16xf32>, vector<16x16xf32>, vector<64x16xf32> -> vector<64x16xf32>
    %cst_21 = arith.constant dense<0.000000e+00> : vector<64x16xf32>
    %36 = tpu.matmul %0, %35, %cst_21 {dimension_numbers = #tpu.dot_dimension_numbers<[1], [0], [0], [1], [0, 0, 1, 1], [], []>} : vector<64x64xf32>, vector<64x16xf32>, vector<64x16xf32> -> vector<64x16xf32>
    %c3 = arith.constant 3 : index
    %c0_22 = arith.constant 0 : index
    %37 = vector.load %arg3[%c3, %c0_22] : memref<12x16xf32, #tpu.memory_space<vmem>>, vector<1x16xf32>
    %38 = vector.broadcast %37 : vector<1x16xf32> to vector<64x16xf32>
    %39 = arith.addf %36, %38 : vector<64x16xf32>
    %c4 = arith.constant 4 : index
    %c0_23 = arith.constant 0 : index
    %40 = vector.load %arg3[%c4, %c0_23] : memref<12x16xf32, #tpu.memory_space<vmem>>, vector<1x16xf32>
    %c5 = arith.constant 5 : index
    %c0_24 = arith.constant 0 : index
    %41 = vector.load %arg3[%c5, %c0_24] : memref<12x16xf32, #tpu.memory_space<vmem>>, vector<1x16xf32>
    %cst_25 = arith.constant dense<0.000000e+00> : vector<64xf32>
    %42 = vector.multi_reduction <add>, %39, %cst_25 [1] : vector<64x16xf32> to vector<64xf32>
    %43 = vector.shape_cast %42 : vector<64xf32> to vector<64x1xf32>
    %cst_26 = arith.constant 1.600000e+01 : f32
    %44 = vector.broadcast %cst_26 : f32 to vector<64x1xf32>
    %45 = arith.divf %43, %44 : vector<64x1xf32>
    %46 = vector.broadcast %45 : vector<64x1xf32> to vector<64x16xf32>
    %47 = arith.subf %39, %46 : vector<64x16xf32>
    %48 = arith.mulf %47, %47 : vector<64x16xf32>
    %cst_27 = arith.constant dense<0.000000e+00> : vector<64xf32>
    %49 = vector.multi_reduction <add>, %48, %cst_27 [1] : vector<64x16xf32> to vector<64xf32>
    %50 = vector.shape_cast %49 : vector<64xf32> to vector<64x1xf32>
    %cst_28 = arith.constant 1.600000e+01 : f32
    %51 = vector.broadcast %cst_28 : f32 to vector<64x1xf32>
    %52 = arith.divf %50, %51 : vector<64x1xf32>
    %cst_29 = arith.constant 9.99999974E-6 : f32
    %53 = vector.broadcast %cst_29 : f32 to vector<64x1xf32>
    %54 = arith.addf %52, %53 : vector<64x1xf32>
    %55 = math.rsqrt %54 : vector<64x1xf32>
    %56 = vector.broadcast %55 : vector<64x1xf32> to vector<64x16xf32>
    %57 = arith.mulf %47, %56 : vector<64x16xf32>
    %58 = vector.broadcast %40 : vector<1x16xf32> to vector<64x16xf32>
    %59 = arith.mulf %57, %58 : vector<64x16xf32>
    %60 = vector.broadcast %41 : vector<1x16xf32> to vector<64x16xf32>
    %61 = arith.addf %59, %60 : vector<64x16xf32>
    %cst_30 = arith.constant 0.000000e+00 : f32
    %62 = vector.broadcast %cst_30 : f32 to vector<64x16xf32>
    %63 = arith.maximumf %61, %62 : vector<64x16xf32>
    %c2_31 = arith.constant 2 : index
    %c0_32 = arith.constant 0 : index
    %c0_33 = arith.constant 0 : index
    %64 = vector.load %arg2[%c2_31, %c0_32, %c0_33] : memref<4x16x16xf32, #tpu.memory_space<vmem>>, vector<1x16x16xf32>
    %65 = vector.shape_cast %64 : vector<1x16x16xf32> to vector<16x16xf32>
    %cst_34 = arith.constant dense<0.000000e+00> : vector<64x16xf32>
    %66 = tpu.matmul %63, %65, %cst_34 {dimension_numbers = #tpu.dot_dimension_numbers<[1], [0], [0], [1], [0, 0, 1, 1], [], []>} : vector<64x16xf32>, vector<16x16xf32>, vector<64x16xf32> -> vector<64x16xf32>
    %cst_35 = arith.constant dense<0.000000e+00> : vector<64x16xf32>
    %67 = tpu.matmul %0, %66, %cst_35 {dimension_numbers = #tpu.dot_dimension_numbers<[1], [0], [0], [1], [0, 0, 1, 1], [], []>} : vector<64x64xf32>, vector<64x16xf32>, vector<64x16xf32> -> vector<64x16xf32>
    %c6 = arith.constant 6 : index
    %c0_36 = arith.constant 0 : index
    %68 = vector.load %arg3[%c6, %c0_36] : memref<12x16xf32, #tpu.memory_space<vmem>>, vector<1x16xf32>
    %69 = vector.broadcast %68 : vector<1x16xf32> to vector<64x16xf32>
    %70 = arith.addf %67, %69 : vector<64x16xf32>
    %c7 = arith.constant 7 : index
    %c0_37 = arith.constant 0 : index
    %71 = vector.load %arg3[%c7, %c0_37] : memref<12x16xf32, #tpu.memory_space<vmem>>, vector<1x16xf32>
    %c8 = arith.constant 8 : index
    %c0_38 = arith.constant 0 : index
    %72 = vector.load %arg3[%c8, %c0_38] : memref<12x16xf32, #tpu.memory_space<vmem>>, vector<1x16xf32>
    %cst_39 = arith.constant dense<0.000000e+00> : vector<64xf32>
    %73 = vector.multi_reduction <add>, %70, %cst_39 [1] : vector<64x16xf32> to vector<64xf32>
    %74 = vector.shape_cast %73 : vector<64xf32> to vector<64x1xf32>
    %cst_40 = arith.constant 1.600000e+01 : f32
    %75 = vector.broadcast %cst_40 : f32 to vector<64x1xf32>
    %76 = arith.divf %74, %75 : vector<64x1xf32>
    %77 = vector.broadcast %76 : vector<64x1xf32> to vector<64x16xf32>
    %78 = arith.subf %70, %77 : vector<64x16xf32>
    %79 = arith.mulf %78, %78 : vector<64x16xf32>
    %cst_41 = arith.constant dense<0.000000e+00> : vector<64xf32>
    %80 = vector.multi_reduction <add>, %79, %cst_41 [1] : vector<64x16xf32> to vector<64xf32>
    %81 = vector.shape_cast %80 : vector<64xf32> to vector<64x1xf32>
    %cst_42 = arith.constant 1.600000e+01 : f32
    %82 = vector.broadcast %cst_42 : f32 to vector<64x1xf32>
    %83 = arith.divf %81, %82 : vector<64x1xf32>
    %cst_43 = arith.constant 9.99999974E-6 : f32
    %84 = vector.broadcast %cst_43 : f32 to vector<64x1xf32>
    %85 = arith.addf %83, %84 : vector<64x1xf32>
    %86 = math.rsqrt %85 : vector<64x1xf32>
    %87 = vector.broadcast %86 : vector<64x1xf32> to vector<64x16xf32>
    %88 = arith.mulf %78, %87 : vector<64x16xf32>
    %89 = vector.broadcast %71 : vector<1x16xf32> to vector<64x16xf32>
    %90 = arith.mulf %88, %89 : vector<64x16xf32>
    %91 = vector.broadcast %72 : vector<1x16xf32> to vector<64x16xf32>
    %92 = arith.addf %90, %91 : vector<64x16xf32>
    %cst_44 = arith.constant 0.000000e+00 : f32
    %93 = vector.broadcast %cst_44 : f32 to vector<64x16xf32>
    %94 = arith.maximumf %92, %93 : vector<64x16xf32>
    %c3_45 = arith.constant 3 : index
    %c0_46 = arith.constant 0 : index
    %c0_47 = arith.constant 0 : index
    %95 = vector.load %arg2[%c3_45, %c0_46, %c0_47] : memref<4x16x16xf32, #tpu.memory_space<vmem>>, vector<1x16x16xf32>
    %96 = vector.shape_cast %95 : vector<1x16x16xf32> to vector<16x16xf32>
    %cst_48 = arith.constant dense<0.000000e+00> : vector<64x16xf32>
    %97 = tpu.matmul %94, %96, %cst_48 {dimension_numbers = #tpu.dot_dimension_numbers<[1], [0], [0], [1], [0, 0, 1, 1], [], []>} : vector<64x16xf32>, vector<16x16xf32>, vector<64x16xf32> -> vector<64x16xf32>
    %cst_49 = arith.constant dense<0.000000e+00> : vector<64x16xf32>
    %98 = tpu.matmul %0, %97, %cst_49 {dimension_numbers = #tpu.dot_dimension_numbers<[1], [0], [0], [1], [0, 0, 1, 1], [], []>} : vector<64x64xf32>, vector<64x16xf32>, vector<64x16xf32> -> vector<64x16xf32>
    %c9 = arith.constant 9 : index
    %c0_50 = arith.constant 0 : index
    %99 = vector.load %arg3[%c9, %c0_50] : memref<12x16xf32, #tpu.memory_space<vmem>>, vector<1x16xf32>
    %100 = vector.broadcast %99 : vector<1x16xf32> to vector<64x16xf32>
    %101 = arith.addf %98, %100 : vector<64x16xf32>
    %c0_51 = arith.constant 0 : index
    %c0_52 = arith.constant 0 : index
    %102 = vector.load %arg4[%c0_51, %c0_52] : memref<64x16xf32, #tpu.memory_space<vmem>>, vector<64x16xf32>
    tpu.vector_store %arg4[%c0_51, %c0_52], %101 {strides = array<i32>} : memref<64x16xf32, #tpu.memory_space<vmem>>, vector<64x16xf32>,
    return
  }
}

</mosaic_0001>

<bundles_post_ra>
// kernel: gcn_forward.1
= control target key start
LH: loop header
LB: loop body
LE: loop exit
PB: predicated region body
PF: predicated region fallthrough
CT: control target
= control target key end

     0   :  { %9 = vsyncpa [#allocation3], 0  ;;  %s1312_s18 = smov [#allocation2]   ;;  %s1313_s20 = smov 128   ;;  %s1884_s0 = inlined_call_operand.vmem [shape: f32[64,64], index: 0, kind: input, shape index: {}]   ;;  %s1885_s1 = inlined_call_operand.vmem [shape: f32[64,16], index: 1, kind: input, shape index: {}]   ;;  %s1886_s2 = inlined_call_operand.hbm [shape: f32[4,16,16], index: 2, kind: input, shape index: {}]   ;;  %s1887_s3 = inlined_call_operand.vmem [shape: f32[12,16], index: 3, kind: input, shape index: {}]   ;;  %s1888_s4 = inlined_call_operand.vmem [shape: f32[64,16], index: 4, kind: output, shape index: {}]  }
   0x1   :  { %s18_s17 = sshll.u32 %s1886_s2, 4  ;;  %s20_s19 = sshll.u32 %s1312_s18, 4  ;;  %s19_s17 = int_to_ptr.hbm [resolvable:$true] %s18_s17  ;;  %s21_s19 = int_to_ptr.vmem [resolvable:$true] %s20_s19 }
   0x2   :  { %s1314_s21 = smov 8  }
   0x3   :  { %26 = dma.hbm_to_vmem [thread:$0]  %s19_s17, 1024, %s21_s19, [#allocation3], %s1313_s20, %s1313_s20, %s1314_s21  }
   0x4   :  { %1310 = dma.done.wait [#allocation3], 1024  }
   0x5   :  { %1311 = vsyncadd [#allocation3], 4294966272  ;;  %v50_v0 = vld [vmem:[#allocation2 + $0x8] sm:$0xff]  ;;  %v49_v1 = vld [vmem:[#allocation2] sm:$0xff]  ;;  %vm51_vm0 = vcmask 130048   ;;  %vm119_vm1 = vcmask 523264  }
   0x6   :  { %90 = vmatpush.msra.mxu0 %v50_v0  ;;  %v41_v2 = vld [vmem:[%s1885_s1] sm:$0xff]  ;;  %v42_v3 = vld [vmem:[%s1885_s1 + $0x8] sm:$0xff]  ;;  %v43_v4 = vld [vmem:[%s1885_s1 + $0x10] sm:$0xff]  ;;  %v1315_v48 = vmov 16.0  }
   0x7   :  { %v44_v5 = vld [vmem:[%s1885_s1 + $0x18] sm:$0xff]  ;;  %v45_v6 = vld [vmem:[%s1885_s1 + $0x20] sm:$0xff]  ;;  %v46_v7 = vld [vmem:[%s1885_s1 + $0x28] sm:$0xff]  ;;  %1228 = vrcp.f32 %v1315_v48 }
   0x8   :  { %91 = vmatpush.msra.mxu0 %v49_v1  ;;  %v47_v8 = vld [vmem:[%s1885_s1 + $0x30] sm:$0xff]  ;;  %v48_v9 = vld [vmem:[%s1885_s1 + $0x38] sm:$0xff]  ;;  %v1379_v18 = vld [vmem:[%s1884_s0] sm:$0xff] }
   0x9   :  { %1150 = vmatmul.msk.f32.vlgmr.msra.gmra.mxu0 %vm51_vm0, %v41_v2  ;;  %v1386_v19 = vld [vmem:[%s1884_s0 + $0x8] sm:$0xff]  ;;  %v1393_v20 = vld [vmem:[%s1884_s0 + $0x10] sm:$0xff]  ;;  %v1400_v21 = vld [vmem:[%s1884_s0 + $0x18] sm:$0xff] }
   0xa   :  { %v1407_v22 = vld [vmem:[%s1884_s0 + $0x20] sm:$0xff]  ;;  %v1414_v23 = vld [vmem:[%s1884_s0 + $0x28] sm:$0xff]  ;;  %v1421_v24 = vld [vmem:[%s1884_s0 + $0x30] sm:$0xff] }
   0xb   :  { %v1428_v25 = vld [vmem:[%s1884_s0 + $0x38] sm:$0xff]  ;;  %v1218_v26 = vld [vmem:[%s1887_s3] ss:$0 sm:$0xff] }
   0xd   :  { %v1229_v49 = vpop.eup %1228 }
   0xe   :  { %v212_v50 = vmul.f32 16.0, %v1229_v49  ;;  %vm216_vm2 = vweird.f32 %v1229_v49 }
  0x10   :  { %v213_v51 = vsub.f32 1.0, %v212_v50 }
  0x11   :  { %1151 = vmatmul.msk.f32.gmra.mxu0 %vm51_vm0, %v42_v3 }
  0x12   :  { %v214_v52 = vmul.f32 %v1229_v49, %v213_v51 }
  0x14   :  { %v215_v53 = vadd.f32 %v1229_v49, %v214_v52 }
  0x16   :  { %v1442_v54 = vsel %vm216_vm2, %v1229_v49, %v215_v53 }
  0x19   :  { %1152 = vmatmul.msk.f32.gmra.mxu0 %vm51_vm0, %v43_v4 }
  0x21   :  { %1153 = vmatmul.msk.f32.gmra.mxu0 %vm51_vm0, %v44_v5 }
  0x29   :  { %1154 = vmatmul.msk.f32.gmra.mxu0 %vm51_vm0, %v45_v6 }
  0x31   :  { %1155 = vmatmul.msk.f32.gmra.mxu0 %vm51_vm0, %v46_v7 }
  0x39   :  { %1156 = vmatmul.msk.f32.gmra.mxu0 %vm51_vm0, %v47_v8 }
  0x41   :  { %1157 = vmatmul.msk.f32.gmra.mxu0 %vm51_vm0, %v48_v9 }
  0x86   :  { %v93_v10 = vpop.f32.mrf.mxu0 }
  0x8e   :  { %v96_v11 = vpop.f32.mrf.mxu0 }
  0x96   :  { %v99_v12 = vpop.f32.mrf.mxu0 }
  0x9e   :  { %v102_v13 = vpop.f32.mrf.mxu0 }
  0xa6   :  { %v105_v14 = vpop.f32.mrf.mxu0 }
  0xae   :  { %v108_v15 = vpop.f32.mrf.mxu0 }
  0xb6   :  { %v111_v16 = vpop.f32.mrf.mxu0 }
  0xbe   :  { %v114_v17 = vpop.f32.mrf.mxu0 }
  0xbf   :  { %152 = vmatpush.msra.mxu1 %v114_v17 }
  0xc1   :  { %153 = vmatpush.msra.mxu1 %v111_v16 }
  0xc3   :  { %154 = vmatpush.msra.mxu1 %v108_v15 }
  0xc5   :  { %155 = vmatpush.msra.mxu1 %v105_v14 }
  0xc7   :  { %156 = vmatpush.msra.mxu1 %v102_v13 }
  0xc9   :  { %157 = vmatpush.msra.mxu1 %v99_v12 }
  0xcb   :  { %158 = vmatpush.msra.mxu1 %v96_v11 }
  0xcd   :  { %159 = vmatpush.msra.mxu1 %v93_v10 }
  0xce   :  { %1158 = vmatmul.msk.f32.vlgmr.msra.gmra.mxu1 %vm119_vm1, %v1379_v18 }
  0xd6   :  { %1159 = vmatmul.msk.f32.gmra.mxu1 %vm119_vm1, %v1386_v19 }
  0xde   :  { %1160 = vmatmul.msk.f32.gmra.mxu1 %vm119_vm1, %v1393_v20 }
  0xe6   :  { %1161 = vmatmul.msk.f32.gmra.mxu1 %vm119_vm1, %v1400_v21 }
  0xee   :  { %1162 = vmatmul.msk.f32.gmra.mxu1 %vm119_vm1, %v1407_v22 }
  0xf6   :  { %1163 = vmatmul.msk.f32.gmra.mxu1 %vm119_vm1, %v1414_v23 }
  0xfe   :  { %1164 = vmatmul.msk.f32.gmra.mxu1 %vm119_vm1, %v1421_v24 }
 0x106   :  { %1165 = vmatmul.msk.f32.gmra.mxu1 %vm119_vm1, %v1428_v25 }
 0x14b   :  { %v161_v27 = vpop.f32.mrf.mxu1 }
 0x14c   :  { %v162_v28 = vadd.f32 %v1218_v26, %v161_v27 }
 0x14e   :  { %v187_v29 = vsel %vm51_vm0, %v162_v28, 0.0 }
 0x14f   :  { %188 = vadd.xlane.f32.xlu0 %v187_v29 }
 0x153   :  { %v164_v30 = vpop.f32.mrf.mxu1 }
 0x154   :  { %v165_v31 = vadd.f32 %v1218_v26, %v164_v30 }
 0x156   :  { %v190_v32 = vsel %vm51_vm0, %v165_v31, 0.0 }
 0x157   :  { %191 = vadd.xlane.f32.xlu0 %v190_v32 }
 0x15b   :  { %v167_v33 = vpop.f32.mrf.mxu1 }
 0x15c   :  { %v168_v34 = vadd.f32 %v1218_v26, %v167_v33 }
 0x15e   :  { %v193_v35 = vsel %vm51_vm0, %v168_v34, 0.0 }
 0x15f   :  { %194 = vadd.xlane.f32.xlu1 %v193_v35 }
 0x163   :  { %v170_v36 = vpop.f32.mrf.mxu1 }
 0x164   :  { %v171_v37 = vadd.f32 %v1218_v26, %v170_v36 }
 0x166   :  { %v196_v38 = vsel %vm51_vm0, %v171_v37, 0.0 }
 0x167   :  { %197 = vadd.xlane.f32.xlu1 %v196_v38  ;;  %v397_v38 = vld [vmem:[#allocation2 + $0x10] sm:$0xff] }
 0x16b   :  { %v173_v39 = vpop.f32.mrf.mxu1 }
 0x16c   :  { %v174_v40 = vadd.f32 %v1218_v26, %v173_v39 }
 0x16e   :  { %v199_v41 = vsel %vm51_vm0, %v174_v40, 0.0 }
 0x16f   :  { %200 = vadd.xlane.f32.xlu2 %v199_v41 }
 0x173   :  { %v176_v42 = vpop.f32.mrf.mxu1 }
 0x174   :  { %v177_v43 = vadd.f32 %v1218_v26, %v176_v42 }
 0x176   :  { %v202_v44 = vsel %vm51_vm0, %v177_v43, 0.0 }
 0x177   :  { %203 = vadd.xlane.f32.xlu2 %v202_v44 }
 0x17b   :  { %v179_v45 = vpop.f32.mrf.mxu1 }
 0x17c   :  { %v180_v46 = vadd.f32 %v1218_v26, %v179_v45 }
 0x17e   :  { %v205_v47 = vsel %vm51_vm0, %v180_v46, 0.0 }
 0x17f   :  { %206 = vadd.xlane.f32.xlu1 %v205_v47 }
 0x183   :  { %v182_v59 = vpop.f32.mrf.mxu1 }
 0x184   :  { %v183_v63 = vadd.f32 %v1218_v26, %v182_v59 }
 0x186   :  { %v208_v1 = vsel %vm51_vm0, %v183_v63, 0.0 }
 0x1c2   :  { %v189_v55 = vpop.xlane.xlu0 %188 }
 0x1c3   :  { %v218_v56 = vmul.f32 %v1442_v54, %v189_v55 }
 0x1c5   :  { %v1445_v57 = vsub.f32 %v162_v28, %v218_v56 }
 0x1c7   :  { %v234_v58 = vmul.f32 %v1445_v57, %v1445_v57 }
 0x1c9   :  { %v242_v60 = vsel %vm51_vm0, %v234_v58, 0.0 }
 0x1ca   :  { %243 = vadd.xlane.f32.xlu0 %v242_v60  ;;  %v192_v61 = vpop.xlane.xlu0 %191 }
 0x1cb   :  { %v219_v62 = vmul.f32 %v1442_v54, %v192_v61 }
 0x1cd   :  { %v1451_v0 = vsub.f32 %v165_v31, %v219_v62 }
 0x1cf   :  { %v235_v2 = vmul.f32 %v1451_v0, %v1451_v0 }
 0x1d1   :  { %v245_v3 = vsel %vm51_vm0, %v235_v2, 0.0 }
 0x1d2   :  { %v195_v4 = vpop.xlane.xlu1 %194  ;;  %209 = vadd.xlane.f32.xlu0 %v208_v1  ;;  %246 = vadd.xlane.f32.xlu2 %v245_v3 }
 0x1d3   :  { %v220_v5 = vmul.f32 %v1442_v54, %v195_v4  ;;  %v1505_v4 = vld [vmem:[%s1887_s3 + $0x2] ss:$0 sm:$0xff] }
 0x1d5   :  { %v1458_v6 = vsub.f32 %v168_v34, %v220_v5 }
 0x1d7   :  { %v236_v7 = vmul.f32 %v1458_v6, %v1458_v6 }
 0x1d9   :  { %v248_v8 = vsel %vm51_vm0, %v236_v7, 0.0 }
 0x1da   :  { %249 = vadd.xlane.f32.xlu1 %v248_v8  ;;  %v198_v9 = vpop.xlane.xlu1 %197 }
 0x1db   :  { %v221_v10 = vmul.f32 %v1442_v54, %v198_v9 }
 0x1dd   :  { %v1464_v11 = vsub.f32 %v171_v37, %v221_v10  ;;  %v398_v37 = vld [vmem:[#allocation2 + $0x18] sm:$0xff] }
 0x1de   :  { %437 = vmatpush.msra.mxu2 %v398_v37 }
 0x1df   :  { %v237_v12 = vmul.f32 %v1464_v11, %v1464_v11 }
 0x1e0   :  { %438 = vmatpush.msra.mxu2 %v397_v38 }
 0x1e1   :  { %v251_v13 = vsel %vm51_vm0, %v237_v12, 0.0 }
 0x1e2   :  { %v201_v14 = vpop.xlane.xlu2 %200  ;;  %252 = vadd.xlane.f32.xlu2 %v251_v13 }
 0x1e3   :  { %v222_v15 = vmul.f32 %v1442_v54, %v201_v14 }
 0x1e5   :  { %v1470_v16 = vsub.f32 %v174_v40, %v222_v15 }
 0x1e7   :  { %v238_v17 = vmul.f32 %v1470_v16, %v1470_v16 }
 0x1e9   :  { %v254_v26 = vsel %vm51_vm0, %v238_v17, 0.0 }
 0x1ea   :  { %v204_v27 = vpop.xlane.xlu2 %203  ;;  %255 = vadd.xlane.f32.xlu0 %v254_v26 }
 0x1eb   :  { %v223_v28 = vmul.f32 %v1442_v54, %v204_v27 }
 0x1ed   :  { %v1476_v29 = vsub.f32 %v177_v43, %v223_v28 }
 0x1ef   :  { %v239_v30 = vmul.f32 %v1476_v29, %v1476_v29 }
 0x1f1   :  { %v257_v31 = vsel %vm51_vm0, %v239_v30, 0.0 }
 0x1f2   :  { %258 = vadd.xlane.f32.xlu1 %v257_v31  ;;  %v207_v32 = vpop.xlane.xlu1 %206 }
 0x1f3   :  { %v224_v33 = vmul.f32 %v1442_v54, %v207_v32 }
 0x1f5   :  { %v1482_v34 = vsub.f32 %v180_v46, %v224_v33 }
 0x1f7   :  { %v240_v35 = vmul.f32 %v1482_v34, %v1482_v34 }
 0x1f9   :  { %v260_v36 = vsel %vm51_vm0, %v240_v35, 0.0 }
 0x1fa   :  { %261 = vadd.xlane.f32.xlu2 %v260_v36 }
 0x23d   :  { %v244_v39 = vpop.xlane.xlu0 %243 }
 0x23e   :  { %v266_v40 = vmul.f32 %v244_v39, %v1442_v54 }
 0x240   :  { %v274_v41 = vadd.f32 1e-05, %v266_v40 }
 0x242   :  { %1230 = vrsqrt.f32 %v274_v41  ;;  %vm288_vm4 = vweird.f32 %v274_v41 }
 0x245   :  { %v247_v42 = vpop.xlane.xlu2 %246  ;;  %v210_v43 = vpop.xlane.xlu0 %209 }
 0x246   :  { %v267_v44 = vmul.f32 %v247_v42, %v1442_v54  ;;  %v225_v45 = vmul.f32 %v1442_v54, %v210_v43 }
 0x248   :  { %v1231_v46 = vpop.eup %1230  ;;  %v275_v47 = vadd.f32 1e-05, %v267_v44  ;;  %v1490_v48 = vsub.f32 %v183_v63, %v225_v45  ;;  %v1499_v63 = vld [vmem:[%s1887_s3 + $0x1] ss:$0 sm:$0xff] }
 0x249   :  { %v283_v49 = vmul.f32 %v1231_v46, %v274_v41  ;;  %vm289_vm3 = vweird.f32 %v1231_v46 }
 0x24a   :  { %1232 = vrsqrt.f32 %v275_v47  ;;  %v241_v50 = vmul.f32 %v1490_v48, %v1490_v48  ;;  %vm290_vm5 = vmor %vm288_vm4, %vm289_vm3  ;;  %vm298_vm7 = vweird.f32 %v275_v47 }
 0x24b   :  { %v284_v51 = vmul.f32 %v1231_v46, %v283_v49 }
 0x24c   :  { %v263_v52 = vsel %vm51_vm0, %v241_v50, 0.0 }
 0x24d   :  { %v285_v53 = vmul.f32 0.5, %v284_v51  ;;  %v250_v55 = vpop.xlane.xlu1 %249  ;;  %264 = vadd.xlane.f32.xlu0 %v263_v52 }
 0x24e   :  { %v268_v56 = vmul.f32 %v250_v55, %v1442_v54 }
 0x24f   :  { %v286_v58 = vsub.f32 1.5, %v285_v53 }
 0x250   :  { %v1233_v59 = vpop.eup %1232  ;;  %v276_v60 = vadd.f32 1e-05, %v268_v56 }
 0x251   :  { %v287_v61 = vmul.f32 %v1231_v46, %v286_v58  ;;  %v293_v62 = vmul.f32 %v1233_v59, %v275_v47  ;;  %vm299_vm6 = vweird.f32 %v1233_v59 }
 0x252   :  { %1234 = vrsqrt.f32 %v276_v60  ;;  %vm300_vm8 = vmor %vm298_vm7, %vm299_vm6  ;;  %vm308_vm10 = vweird.f32 %v276_v60 }
 0x253   :  { %v291_v1 = vsel %vm290_vm5, %v1231_v46, %v287_v61  ;;  %v294_v2 = vmul.f32 %v1233_v59, %v293_v62 }
 0x254   :  { %v362_v3 = vmul.f32 %v291_v1, %v1445_v57 }
 0x255   :  { %v295_v5 = vmul.f32 0.5, %v294_v2  ;;  %v253_v7 = vpop.xlane.xlu2 %252 }
 0x256   :  { %v269_v8 = vmul.f32 %v253_v7, %v1442_v54  ;;  %v371_v9 = vmul.f32 %v1499_v63, %v362_v3 }
 0x257   :  { %v296_v10 = vsub.f32 1.5, %v295_v5 }
 0x258   :  { %v1235_v12 = vpop.eup %1234  ;;  %v277_v13 = vadd.f32 1e-05, %v269_v8  ;;  %v380_v14 = vadd.f32 %v1505_v4, %v371_v9 }
 0x259   :  { %v297_v15 = vmul.f32 %v1233_v59, %v296_v10  ;;  %v303_v57 = vmul.f32 %v1235_v12, %v276_v60  ;;  %vm309_vm9 = vweird.f32 %v1235_v12 }
 0x25a   :  { %1236 = vrsqrt.f32 %v277_v13  ;;  %v388_v17 = vmax.f32 %v380_v14, 0.0  ;;  %vm310_vm11 = vmor %vm308_vm10, %vm309_vm9  ;;  %vm318_vm13 = vweird.f32 %v277_v13 }
 0x25b   :  { %v301_v26 = vsel %vm300_vm8, %v1233_v59, %v297_v15  ;;  %v304_v27 = vmul.f32 %v1235_v12, %v303_v57 }
 0x25c   :  { %1166 = vmatmul.msk.f32.vlgmr.msra.gmra.mxu2 %vm51_vm0, %v388_v17  ;;  %v363_v28 = vmul.f32 %v301_v26, %v1451_v0 }
 0x25d   :  { %v305_v30 = vmul.f32 0.5, %v304_v27  ;;  %v256_v31 = vpop.xlane.xlu0 %255 }
 0x25e   :  { %v270_v32 = vmul.f32 %v256_v31, %v1442_v54  ;;  %v372_v33 = vmul.f32 %v1499_v63, %v363_v28 }
 0x25f   :  { %v306_v35 = vsub.f32 1.5, %v305_v30 }
 0x260   :  { %v1237_v36 = vpop.eup %1236  ;;  %v278_v37 = vadd.f32 1e-05, %v270_v32  ;;  %v381_v38 = vadd.f32 %v1505_v4, %v372_v33 }
 0x261   :  { %v307_v39 = vmul.f32 %v1235_v12, %v306_v35  ;;  %v313_v40 = vmul.f32 %v1237_v36, %v277_v13  ;;  %vm319_vm12 = vweird.f32 %v1237_v36 }
 0x262   :  { %1238 = vrsqrt.f32 %v278_v37  ;;  %v389_v41 = vmax.f32 %v381_v38, 0.0  ;;  %vm320_vm14 = vmor %vm318_vm13, %vm319_vm12  ;;  %vm328_vm2 = vweird.f32 %v278_v37 }
 0x263   :  { %v311_v42 = vsel %vm310_vm11, %v1235_v12, %v307_v39  ;;  %v314_v0 = vmul.f32 %v1237_v36, %v313_v40 }
 0x264   :  { %1167 = vmatmul.msk.f32.gmra.mxu2 %vm51_vm0, %v389_v41  ;;  %v364_v43 = vmul.f32 %v311_v42, %v1458_v6 }
 0x265   :  { %v315_v44 = vmul.f32 0.5, %v314_v0  ;;  %v259_v45 = vpop.xlane.xlu1 %258 }
 0x266   :  { %v271_v46 = vmul.f32 %v259_v45, %v1442_v54  ;;  %v373_v47 = vmul.f32 %v1499_v63, %v364_v43 }
 0x267   :  { %v316_v49 = vsub.f32 1.5, %v315_v44 }
 0x268   :  { %v1239_v50 = vpop.eup %1238  ;;  %v279_v51 = vadd.f32 1e-05, %v271_v46  ;;  %v382_v52 = vadd.f32 %v1505_v4, %v373_v47 }
 0x269   :  { %v317_v53 = vmul.f32 %v1237_v36, %v316_v49  ;;  %v323_v55 = vmul.f32 %v1239_v50, %v278_v37  ;;  %vm329_vm15 = vweird.f32 %v1239_v50 }
 0x26a   :  { %1240 = vrsqrt.f32 %v279_v51  ;;  %v390_v56 = vmax.f32 %v382_v52, 0.0  ;;  %vm330_vm3 = vmor %vm328_vm2, %vm329_vm15  ;;  %vm338_vm5 = vweird.f32 %v279_v51 }
 0x26b   :  { %v321_v58 = vsel %vm320_vm14, %v1237_v36, %v317_v53  ;;  %v324_v6 = vmul.f32 %v1239_v50, %v323_v55 }
 0x26c   :  { %1168 = vmatmul.msk.f32.gmra.mxu2 %vm51_vm0, %v390_v56  ;;  %v365_v59 = vmul.f32 %v321_v58, %v1464_v11 }
 0x26d   :  { %v325_v60 = vmul.f32 0.5, %v324_v6  ;;  %v262_v61 = vpop.xlane.xlu2 %261 }
 0x26e   :  { %v272_v62 = vmul.f32 %v262_v61, %v1442_v54  ;;  %v374_v1 = vmul.f32 %v1499_v63, %v365_v59 }
 0x26f   :  { %v326_v2 = vsub.f32 1.5, %v325_v60 }
 0x270   :  { %v1241_v3 = vpop.eup %1240  ;;  %v280_v5 = vadd.f32 1e-05, %v272_v62  ;;  %v383_v7 = vadd.f32 %v1505_v4, %v374_v1 }
 0x271   :  { %v327_v8 = vmul.f32 %v1239_v50, %v326_v2  ;;  %v333_v9 = vmul.f32 %v1241_v3, %v279_v51  ;;  %vm339_vm4 = vweird.f32 %v1241_v3 }
 0x272   :  { %1242 = vrsqrt.f32 %v280_v5  ;;  %v391_v10 = vmax.f32 %v383_v7, 0.0  ;;  %vm340_vm6 = vmor %vm338_vm5, %vm339_vm4  ;;  %vm348_vm8 = vweird.f32 %v280_v5 }
 0x273   :  { %v331_v12 = vsel %vm330_vm3, %v1239_v50, %v327_v8  ;;  %v334_v11 = vmul.f32 %v1241_v3, %v333_v9 }
 0x274   :  { %1169 = vmatmul.msk.f32.gmra.mxu2 %vm51_vm0, %v391_v10  ;;  %v366_v13 = vmul.f32 %v331_v12, %v1470_v16 }
 0x275   :  { %v335_v14 = vmul.f32 0.5, %v334_v11 }
 0x276   :  { %v375_v15 = vmul.f32 %v1499_v63, %v366_v13 }
 0x277   :  { %v336_v57 = vsub.f32 1.5, %v335_v14 }
 0x278   :  { %v1243_v17 = vpop.eup %1242  ;;  %v384_v26 = vadd.f32 %v1505_v4, %v375_v15 }
 0x279   :  { %v337_v27 = vmul.f32 %v1241_v3, %v336_v57  ;;  %v343_v28 = vmul.f32 %v1243_v17, %v280_v5  ;;  %vm349_vm7 = vweird.f32 %v1243_v17 }
 0x27a   :  { %v392_v30 = vmax.f32 %v384_v26, 0.0  ;;  %vm350_vm9 = vmor %vm348_vm8, %vm349_vm7 }
 0x27b   :  { %v341_v31 = vsel %vm340_vm6, %v1241_v3, %v337_v27  ;;  %v344_v32 = vmul.f32 %v1243_v17, %v343_v28 }
 0x27c   :  { %1170 = vmatmul.msk.f32.gmra.mxu2 %vm51_vm0, %v392_v30  ;;  %v367_v33 = vmul.f32 %v341_v31, %v1476_v29 }
 0x27d   :  { %v345_v16 = vmul.f32 0.5, %v344_v32 }
 0x27e   :  { %v376_v35 = vmul.f32 %v1499_v63, %v367_v33 }
 0x27f   :  { %v346_v36 = vsub.f32 1.5, %v345_v16 }
 0x280   :  { %v385_v37 = vadd.f32 %v1505_v4, %v376_v35 }
 0x281   :  { %v347_v38 = vmul.f32 %v1243_v17, %v346_v36 }
 0x282   :  { %v393_v39 = vmax.f32 %v385_v37, 0.0 }
 0x283   :  { %v351_v40 = vsel %vm350_vm9, %v1243_v17, %v347_v38 }
 0x284   :  { %1171 = vmatmul.msk.f32.gmra.mxu2 %vm51_vm0, %v393_v39  ;;  %v368_v41 = vmul.f32 %v351_v40, %v1482_v34 }
 0x286   :  { %v377_v42 = vmul.f32 %v1499_v63, %v368_v41 }
 0x288   :  { %v386_v29 = vadd.f32 %v1505_v4, %v377_v42 }
 0x28a   :  { %v394_v0 = vmax.f32 %v386_v29, 0.0 }
 0x28c   :  { %1172 = vmatmul.msk.f32.gmra.mxu2 %vm51_vm0, %v394_v0 }
 0x2c0   :  { %v265_v43 = vpop.xlane.xlu0 %264 }
 0x2c1   :  { %v273_v44 = vmul.f32 %v265_v43, %v1442_v54 }
 0x2c3   :  { %v281_v45 = vadd.f32 1e-05, %v273_v44 }
 0x2c5   :  { %1244 = vrsqrt.f32 %v281_v45  ;;  %vm358_vm11 = vweird.f32 %v281_v45 }
 0x2cb   :  { %v1245_v46 = vpop.eup %1244 }
 0x2cc   :  { %v353_v47 = vmul.f32 %v1245_v46, %v281_v45  ;;  %vm359_vm10 = vweird.f32 %v1245_v46 }
 0x2cd   :  { %vm360_vm12 = vmor %vm358_vm11, %vm359_vm10 }
 0x2ce   :  { %v354_v49 = vmul.f32 %v1245_v46, %v353_v47 }
 0x2d0   :  { %v355_v50 = vmul.f32 0.5, %v354_v49 }
 0x2d2   :  { %v356_v51 = vsub.f32 1.5, %v355_v50 }
 0x2d4   :  { %v357_v52 = vmul.f32 %v1245_v46, %v356_v51 }
 0x2d6   :  { %v361_v34 = vsel %vm360_vm12, %v1245_v46, %v357_v52 }
 0x2d7   :  { %v369_v53 = vmul.f32 %v361_v34, %v1490_v48 }
 0x2d9   :  { %v378_v55 = vmul.f32 %v1499_v63, %v369_v53 }
 0x2db   :  { %v387_v56 = vadd.f32 %v1505_v4, %v378_v55 }
 0x2dd   :  { %v395_v58 = vmax.f32 %v387_v56, 0.0 }
 0x2df   :  { %1173 = vmatmul.msk.f32.gmra.mxu2 %vm51_vm0, %v395_v58  ;;  %v440_v6 = vpop.f32.mrf.mxu2 }
 0x2e7   :  { %v443_v59 = vpop.f32.mrf.mxu2 }
 0x2ef   :  { %v446_v60 = vpop.f32.mrf.mxu2 }
 0x2f7   :  { %v449_v61 = vpop.f32.mrf.mxu2 }
 0x2ff   :  { %v452_v62 = vpop.f32.mrf.mxu2 }
 0x307   :  { %v455_v1 = vpop.f32.mrf.mxu2 }
 0x30f   :  { %v458_v2 = vpop.f32.mrf.mxu2 }
 0x362   :  { %v461_v3 = vpop.f32.mrf.mxu2 }
 0x363   :  { %474 = vmatpush.msra.mxu3 %v461_v3 }
 0x365   :  { %475 = vmatpush.msra.mxu3 %v458_v2  ;;  %v712_v2 = vld [vmem:[#allocation2 + $0x20] sm:$0xff] }
 0x367   :  { %476 = vmatpush.msra.mxu3 %v455_v1  ;;  %v713_v1 = vld [vmem:[#allocation2 + $0x28] sm:$0xff] }
 0x368   :  { %752 = vmatpush.msrb.mxu0 %v713_v1 }
 0x369   :  { %477 = vmatpush.msra.mxu3 %v452_v62 }
 0x36a   :  { %753 = vmatpush.msrb.mxu0 %v712_v2 }
 0x36b   :  { %478 = vmatpush.msra.mxu3 %v449_v61 }
 0x36d   :  { %479 = vmatpush.msra.mxu3 %v446_v60 }
 0x36f   :  { %480 = vmatpush.msra.mxu3 %v443_v59 }
 0x371   :  { %481 = vmatpush.msra.mxu3 %v440_v6 }
 0x372   :  { %1174 = vmatmul.msk.f32.vlgmr.msra.gmra.mxu3 %vm119_vm1, %v1379_v18  ;;  %v1221_v18 = vld [vmem:[%s1887_s3 + $0x3] ss:$0 sm:$0xff] }
 0x37a   :  { %1175 = vmatmul.msk.f32.gmra.mxu3 %vm119_vm1, %v1386_v19 }
 0x382   :  { %1176 = vmatmul.msk.f32.gmra.mxu3 %vm119_vm1, %v1393_v20 }
 0x38a   :  { %1177 = vmatmul.msk.f32.gmra.mxu3 %vm119_vm1, %v1400_v21 }
 0x392   :  { %1178 = vmatmul.msk.f32.gmra.mxu3 %vm119_vm1, %v1407_v22 }
 0x39a   :  { %1179 = vmatmul.msk.f32.gmra.mxu3 %vm119_vm1, %v1414_v23 }
 0x3a2   :  { %1180 = vmatmul.msk.f32.gmra.mxu3 %vm119_vm1, %v1421_v24 }
 0x3aa   :  { %1181 = vmatmul.msk.f32.gmra.mxu3 %vm119_vm1, %v1428_v25 }
 0x3f5   :  { %v483_v19 = vpop.f32.mrf.mxu3 }
 0x3f6   :  { %v484_v20 = vadd.f32 %v1221_v18, %v483_v19 }
 0x3f8   :  { %v509_v21 = vsel %vm51_vm0, %v484_v20, 0.0 }
 0x3f9   :  { %510 = vadd.xlane.f32.xlu1 %v509_v21 }
 0x3fd   :  { %v486_v48 = vpop.f32.mrf.mxu3 }
 0x3fe   :  { %v487_v22 = vadd.f32 %v1221_v18, %v486_v48 }
 0x400   :  { %v512_v63 = vsel %vm51_vm0, %v487_v22, 0.0 }
 0x401   :  { %513 = vadd.xlane.f32.xlu2 %v512_v63 }
 0x405   :  { %v489_v23 = vpop.f32.mrf.mxu3 }
 0x406   :  { %v490_v4 = vadd.f32 %v1221_v18, %v489_v23 }
 0x408   :  { %v515_v24 = vsel %vm51_vm0, %v490_v4, 0.0 }
 0x409   :  { %516 = vadd.xlane.f32.xlu0 %v515_v24 }
 0x40d   :  { %v492_v25 = vpop.f32.mrf.mxu3 }
 0x40e   :  { %v493_v5 = vadd.f32 %v1221_v18, %v492_v25 }
 0x410   :  { %v518_v7 = vsel %vm51_vm0, %v493_v5, 0.0 }
 0x411   :  { %519 = vadd.xlane.f32.xlu1 %v518_v7 }
 0x415   :  { %v495_v8 = vpop.f32.mrf.mxu3 }
 0x416   :  { %v496_v9 = vadd.f32 %v1221_v18, %v495_v8 }
 0x418   :  { %v521_v10 = vsel %vm51_vm0, %v496_v9, 0.0 }
 0x419   :  { %522 = vadd.xlane.f32.xlu2 %v521_v10 }
 0x41d   :  { %v498_v12 = vpop.f32.mrf.mxu3 }
 0x41e   :  { %v499_v11 = vadd.f32 %v1221_v18, %v498_v12 }
 0x420   :  { %v524_v13 = vsel %vm51_vm0, %v499_v11, 0.0 }
 0x421   :  { %525 = vadd.xlane.f32.xlu0 %v524_v13 }
 0x425   :  { %v501_v14 = vpop.f32.mrf.mxu3 }
 0x426   :  { %v502_v15 = vadd.f32 %v1221_v18, %v501_v14 }
 0x428   :  { %v527_v57 = vsel %vm51_vm0, %v502_v15, 0.0 }
 0x429   :  { %528 = vadd.xlane.f32.xlu2 %v527_v57  ;;  %v1624_v57 = vld [vmem:[%s1887_s3 + $0x4] ss:$0 sm:$0xff] }
 0x42d   :  { %v504_v30 = vpop.f32.mrf.mxu3 }
 0x42e   :  { %v505_v16 = vadd.f32 %v1221_v18, %v504_v30  ;;  %v1630_v30 = vld [vmem:[%s1887_s3 + $0x5] ss:$0 sm:$0xff] }
 0x430   :  { %v530_v37 = vsel %vm51_vm0, %v505_v16, 0.0 }
 0x46c   :  { %v511_v17 = vpop.xlane.xlu1 %510 }
 0x46d   :  { %v533_v26 = vmul.f32 %v511_v17, %v1442_v54 }
 0x46f   :  { %v1570_v27 = vsub.f32 %v484_v20, %v533_v26 }
 0x471   :  { %v549_v28 = vmul.f32 %v1570_v27, %v1570_v27 }
 0x473   :  { %v557_v31 = vsel %vm51_vm0, %v549_v28, 0.0 }
 0x474   :  { %v514_v32 = vpop.xlane.xlu2 %513  ;;  %558 = vadd.xlane.f32.xlu1 %v557_v31 }
 0x475   :  { %v534_v33 = vmul.f32 %v514_v32, %v1442_v54 }
 0x477   :  { %v1576_v35 = vsub.f32 %v487_v22, %v534_v33 }
 0x479   :  { %v550_v36 = vmul.f32 %v1576_v35, %v1576_v35 }
 0x47b   :  { %v560_v38 = vsel %vm51_vm0, %v550_v36, 0.0 }
 0x47c   :  { %v517_v39 = vpop.xlane.xlu0 %516  ;;  %561 = vadd.xlane.f32.xlu0 %v560_v38  ;;  %531 = vadd.xlane.f32.xlu1 %v530_v37 }
 0x47d   :  { %v535_v40 = vmul.f32 %v517_v39, %v1442_v54 }
 0x47f   :  { %v1583_v41 = vsub.f32 %v490_v4, %v535_v40 }
 0x481   :  { %v551_v42 = vmul.f32 %v1583_v41, %v1583_v41 }
 0x483   :  { %v563_v29 = vsel %vm51_vm0, %v551_v42, 0.0 }
 0x484   :  { %564 = vadd.xlane.f32.xlu2 %v563_v29  ;;  %v520_v0 = vpop.xlane.xlu1 %519 }
 0x485   :  { %v536_v43 = vmul.f32 %v520_v0, %v1442_v54 }
 0x487   :  { %v1589_v44 = vsub.f32 %v493_v5, %v536_v43 }
 0x489   :  { %v552_v45 = vmul.f32 %v1589_v44, %v1589_v44 }
 0x48b   :  { %v566_v46 = vsel %vm51_vm0, %v552_v45, 0.0 }
 0x48c   :  { %v523_v47 = vpop.xlane.xlu2 %522  ;;  %567 = vadd.xlane.f32.xlu0 %v566_v46 }
 0x48d   :  { %v537_v49 = vmul.f32 %v523_v47, %v1442_v54 }
 0x48f   :  { %v1595_v50 = vsub.f32 %v496_v9, %v537_v49 }
 0x491   :  { %v553_v51 = vmul.f32 %v1595_v50, %v1595_v50 }
 0x493   :  { %v569_v52 = vsel %vm51_vm0, %v553_v51, 0.0 }
 0x494   :  { %v526_v34 = vpop.xlane.xlu0 %525  ;;  %570 = vadd.xlane.f32.xlu1 %v569_v52 }
 0x495   :  { %v538_v53 = vmul.f32 %v526_v34, %v1442_v54 }
 0x497   :  { %v1601_v55 = vsub.f32 %v499_v11, %v538_v53 }
 0x499   :  { %v554_v56 = vmul.f32 %v1601_v55, %v1601_v55 }
 0x49b   :  { %v572_v58 = vsel %vm51_vm0, %v554_v56, 0.0 }
 0x49c   :  { %573 = vadd.xlane.f32.xlu2 %v572_v58  ;;  %v529_v6 = vpop.xlane.xlu2 %528 }
 0x49d   :  { %v539_v59 = vmul.f32 %v529_v6, %v1442_v54 }
 0x49f   :  { %v1607_v60 = vsub.f32 %v502_v15, %v539_v59 }
 0x4a1   :  { %v555_v61 = vmul.f32 %v1607_v60, %v1607_v60 }
 0x4a3   :  { %v575_v62 = vsel %vm51_vm0, %v555_v61, 0.0 }
 0x4a4   :  { %576 = vadd.xlane.f32.xlu0 %v575_v62 }
 0x4e7   :  { %v559_v3 = vpop.xlane.xlu1 %558 }
 0x4e8   :  { %v581_v18 = vmul.f32 %v559_v3, %v1442_v54 }
 0x4ea   :  { %v589_v19 = vadd.f32 1e-05, %v581_v18 }
 0x4ec   :  { %1246 = vrsqrt.f32 %v589_v19  ;;  %vm603_vm14 = vweird.f32 %v589_v19 }
 0x4ef   :  { %v562_v20 = vpop.xlane.xlu0 %561  ;;  %v532_v21 = vpop.xlane.xlu1 %531 }
 0x4f0   :  { %v582_v48 = vmul.f32 %v562_v20, %v1442_v54  ;;  %v540_v22 = vmul.f32 %v532_v21, %v1442_v54 }
 0x4f2   :  { %v1247_v63 = vpop.eup %1246  ;;  %v590_v23 = vadd.f32 1e-05, %v582_v48  ;;  %v1615_v4 = vsub.f32 %v505_v16, %v540_v22 }
 0x4f3   :  { %v598_v24 = vmul.f32 %v1247_v63, %v589_v19  ;;  %vm604_vm13 = vweird.f32 %v1247_v63 }
 0x4f4   :  { %1248 = vrsqrt.f32 %v590_v23  ;;  %v556_v25 = vmul.f32 %v1615_v4, %v1615_v4  ;;  %vm605_vm15 = vmor %vm603_vm14, %vm604_vm13  ;;  %vm613_vm3 = vweird.f32 %v590_v23 }
 0x4f5   :  { %v599_v5 = vmul.f32 %v1247_v63, %v598_v24 }
 0x4f6   :  { %v578_v7 = vsel %vm51_vm0, %v556_v25, 0.0 }
 0x4f7   :  { %v600_v8 = vmul.f32 0.5, %v599_v5  ;;  %v565_v9 = vpop.xlane.xlu2 %564  ;;  %579 = vadd.xlane.f32.xlu1 %v578_v7 }
 0x4f8   :  { %v583_v10 = vmul.f32 %v565_v9, %v1442_v54 }
 0x4f9   :  { %v601_v12 = vsub.f32 1.5, %v600_v8 }
 0x4fa   :  { %v1249_v11 = vpop.eup %1248  ;;  %v591_v13 = vadd.f32 1e-05, %v583_v10 }
 0x4fb   :  { %v602_v14 = vmul.f32 %v1247_v63, %v601_v12  ;;  %v608_v15 = vmul.f32 %v1249_v11, %v590_v23  ;;  %vm614_vm2 = vweird.f32 %v1249_v11 }
 0x4fc   :  { %1250 = vrsqrt.f32 %v591_v13  ;;  %vm615_vm4 = vmor %vm613_vm3, %vm614_vm2  ;;  %vm623_vm6 = vweird.f32 %v591_v13 }
 0x4fd   :  { %v606_v17 = vsel %vm605_vm15, %v1247_v63, %v602_v14  ;;  %v609_v26 = vmul.f32 %v1249_v11, %v608_v15 }
 0x4fe   :  { %v677_v28 = vmul.f32 %v606_v17, %v1570_v27 }
 0x4ff   :  { %v610_v31 = vmul.f32 0.5, %v609_v26  ;;  %v568_v32 = vpop.xlane.xlu0 %567 }
 0x500   :  { %v584_v33 = vmul.f32 %v568_v32, %v1442_v54  ;;  %v686_v16 = vmul.f32 %v1624_v57, %v677_v28 }
 0x501   :  { %v611_v36 = vsub.f32 1.5, %v610_v31 }
 0x502   :  { %v1251_v37 = vpop.eup %1250  ;;  %v592_v38 = vadd.f32 1e-05, %v584_v33  ;;  %v695_v39 = vadd.f32 %v1630_v30, %v686_v16 }
 0x503   :  { %v612_v40 = vmul.f32 %v1249_v11, %v611_v36  ;;  %v618_v27 = vmul.f32 %v1251_v37, %v591_v13  ;;  %vm624_vm5 = vweird.f32 %v1251_v37 }
 0x504   :  { %1252 = vrsqrt.f32 %v592_v38  ;;  %v703_v42 = vmax.f32 %v695_v39, 0.0  ;;  %vm625_vm7 = vmor %vm623_vm6, %vm624_vm5  ;;  %vm633_vm9 = vweird.f32 %v592_v38 }
 0x505   :  { %v616_v29 = vsel %vm615_vm4, %v1249_v11, %v612_v40  ;;  %v619_v0 = vmul.f32 %v1251_v37, %v618_v27 }
 0x506   :  { %1182 = vmatmul.msk.f32.vlgmr.msrb.gmra.mxu0 %vm51_vm0, %v703_v42  ;;  %v678_v43 = vmul.f32 %v616_v29, %v1576_v35 }
 0x507   :  { %v620_v45 = vmul.f32 0.5, %v619_v0  ;;  %v571_v46 = vpop.xlane.xlu1 %570 }
 0x508   :  { %v585_v47 = vmul.f32 %v571_v46, %v1442_v54  ;;  %v687_v49 = vmul.f32 %v1624_v57, %v678_v43 }
 0x509   :  { %v621_v51 = vsub.f32 1.5, %v620_v45 }
 0x50a   :  { %v1253_v52 = vpop.eup %1252  ;;  %v593_v34 = vadd.f32 1e-05, %v585_v47  ;;  %v696_v53 = vadd.f32 %v1630_v30, %v687_v49 }
 0x50b   :  { %v622_v56 = vmul.f32 %v1251_v37, %v621_v51  ;;  %v628_v58 = vmul.f32 %v1253_v52, %v592_v38  ;;  %vm634_vm8 = vweird.f32 %v1253_v52 }
 0x50c   :  { %1254 = vrsqrt.f32 %v593_v34  ;;  %v704_v6 = vmax.f32 %v696_v53, 0.0  ;;  %vm635_vm10 = vmor %vm633_vm9, %vm634_vm8  ;;  %vm643_vm12 = vweird.f32 %v593_v34 }
 0x50d   :  { %v626_v59 = vsel %vm625_vm7, %v1251_v37, %v622_v56  ;;  %v629_v35 = vmul.f32 %v1253_v52, %v628_v58 }
 0x50e   :  { %1183 = vmatmul.msk.f32.gmra.mxu0 %vm51_vm0, %v704_v6  ;;  %v679_v61 = vmul.f32 %v626_v59, %v1583_v41 }
 0x50f   :  { %v630_v62 = vmul.f32 0.5, %v629_v35  ;;  %v574_v1 = vpop.xlane.xlu2 %573 }
 0x510   :  { %v586_v2 = vmul.f32 %v574_v1, %v1442_v54  ;;  %v688_v3 = vmul.f32 %v1624_v57, %v679_v61 }
 0x511   :  { %v631_v18 = vsub.f32 1.5, %v630_v62 }
 0x512   :  { %v1255_v19 = vpop.eup %1254  ;;  %v594_v20 = vadd.f32 1e-05, %v586_v2  ;;  %v697_v21 = vadd.f32 %v1630_v30, %v688_v3 }
 0x513   :  { %v632_v48 = vmul.f32 %v1253_v52, %v631_v18  ;;  %v638_v22 = vmul.f32 %v1255_v19, %v593_v34  ;;  %vm644_vm11 = vweird.f32 %v1255_v19 }
 0x514   :  { %1256 = vrsqrt.f32 %v594_v20  ;;  %v705_v63 = vmax.f32 %v697_v21, 0.0  ;;  %vm645_vm13 = vmor %vm643_vm12, %vm644_vm11  ;;  %vm653_vm15 = vweird.f32 %v594_v20 }
 0x515   :  { %v636_v23 = vsel %vm635_vm10, %v1253_v52, %v632_v48  ;;  %v639_v41 = vmul.f32 %v1255_v19, %v638_v22 }
 0x516   :  { %1184 = vmatmul.msk.f32.gmra.mxu0 %vm51_vm0, %v705_v63  ;;  %v680_v24 = vmul.f32 %v636_v23, %v1589_v44 }
 0x517   :  { %v640_v25 = vmul.f32 0.5, %v639_v41  ;;  %v577_v5 = vpop.xlane.xlu0 %576  ;;  %v1692_v41 = vld [vmem:[%s1884_s0 + $0x18] sm:$0xff] }
 0x518   :  { %v587_v7 = vmul.f32 %v577_v5, %v1442_v54  ;;  %v689_v8 = vmul.f32 %v1624_v57, %v680_v24  ;;  %v1699_v24 = vld [vmem:[%s1884_s0 + $0x20] sm:$0xff]  ;;  %v1713_v5 = vld [vmem:[%s1884_s0 + $0x30] sm:$0xff] }
 0x519   :  { %v641_v9 = vsub.f32 1.5, %v640_v25  ;;  %v1706_v25 = vld [vmem:[%s1884_s0 + $0x28] sm:$0xff] }
 0x51a   :  { %v1257_v10 = vpop.eup %1256  ;;  %v595_v12 = vadd.f32 1e-05, %v587_v7  ;;  %v698_v11 = vadd.f32 %v1630_v30, %v689_v8  ;;  %v1720_v7 = vld [vmem:[%s1884_s0 + $0x38] sm:$0xff]  ;;  %v1224_v8 = vld [vmem:[%s1887_s3 + $0x6] ss:$0 sm:$0xff] }
 0x51b   :  { %v642_v13 = vmul.f32 %v1255_v19, %v641_v9  ;;  %v648_v14 = vmul.f32 %v1257_v10, %v594_v20  ;;  %vm654_vm14 = vweird.f32 %v1257_v10 }
 0x51c   :  { %1258 = vrsqrt.f32 %v595_v12  ;;  %v706_v15 = vmax.f32 %v698_v11, 0.0  ;;  %vm655_vm2 = vmor %vm653_vm15, %vm654_vm14  ;;  %vm663_vm4 = vweird.f32 %v595_v12 }
 0x51d   :  { %v646_v17 = vsel %vm645_vm13, %v1255_v19, %v642_v13  ;;  %v649_v44 = vmul.f32 %v1257_v10, %v648_v14 }
 0x51e   :  { %1185 = vmatmul.msk.f32.gmra.mxu0 %vm51_vm0, %v706_v15  ;;  %v681_v26 = vmul.f32 %v646_v17, %v1595_v50 }
 0x51f   :  { %v650_v28 = vmul.f32 0.5, %v649_v44 }
 0x520   :  { %v690_v31 = vmul.f32 %v1624_v57, %v681_v26 }
 0x521   :  { %v651_v32 = vsub.f32 1.5, %v650_v28 }
 0x522   :  { %v1259_v33 = vpop.eup %1258  ;;  %v699_v16 = vadd.f32 %v1630_v30, %v690_v31 }
 0x523   :  { %v652_v36 = vmul.f32 %v1257_v10, %v651_v32  ;;  %v658_v37 = vmul.f32 %v1259_v33, %v595_v12  ;;  %vm664_vm3 = vweird.f32 %v1259_v33 }
 0x524   :  { %v707_v38 = vmax.f32 %v699_v16, 0.0  ;;  %vm665_vm5 = vmor %vm663_vm4, %vm664_vm3 }
 0x525   :  { %v656_v39 = vsel %vm655_vm2, %v1257_v10, %v652_v36  ;;  %v659_v40 = vmul.f32 %v1259_v33, %v658_v37 }
 0x526   :  { %1186 = vmatmul.msk.f32.gmra.mxu0 %vm51_vm0, %v707_v38  ;;  %v682_v27 = vmul.f32 %v656_v39, %v1601_v55 }
 0x527   :  { %v660_v50 = vmul.f32 0.5, %v659_v40 }
 0x528   :  { %v691_v42 = vmul.f32 %v1624_v57, %v682_v27 }
 0x529   :  { %v661_v29 = vsub.f32 1.5, %v660_v50 }
 0x52a   :  { %v700_v0 = vadd.f32 %v1630_v30, %v691_v42 }
 0x52b   :  { %v662_v43 = vmul.f32 %v1259_v33, %v661_v29 }
 0x52c   :  { %v708_v45 = vmax.f32 %v700_v0, 0.0 }
 0x52d   :  { %v666_v46 = vsel %vm665_vm5, %v1259_v33, %v662_v43 }
 0x52e   :  { %1187 = vmatmul.msk.f32.gmra.mxu0 %vm51_vm0, %v708_v45  ;;  %v683_v47 = vmul.f32 %v666_v46, %v1607_v60 }
 0x530   :  { %v692_v49 = vmul.f32 %v1624_v57, %v683_v47 }
 0x532   :  { %v701_v55 = vadd.f32 %v1630_v30, %v692_v49 }
 0x534   :  { %v709_v51 = vmax.f32 %v701_v55, 0.0 }
 0x536   :  { %1188 = vmatmul.msk.f32.gmra.mxu0 %vm51_vm0, %v709_v51 }
 0x56a   :  { %v580_v52 = vpop.xlane.xlu1 %579 }
 0x56b   :  { %v588_v34 = vmul.f32 %v580_v52, %v1442_v54 }
 0x56d   :  { %v596_v53 = vadd.f32 1e-05, %v588_v34 }
 0x56f   :  { %1260 = vrsqrt.f32 %v596_v53  ;;  %vm673_vm7 = vweird.f32 %v596_v53 }
 0x575   :  { %v1261_v56 = vpop.eup %1260 }
 0x576   :  { %v668_v58 = vmul.f32 %v1261_v56, %v596_v53  ;;  %vm674_vm6 = vweird.f32 %v1261_v56 }
 0x577   :  { %vm675_vm8 = vmor %vm673_vm7, %vm674_vm6 }
 0x578   :  { %v669_v6 = vmul.f32 %v1261_v56, %v668_v58 }
 0x57a   :  { %v670_v59 = vmul.f32 0.5, %v669_v6 }
 0x57c   :  { %v671_v35 = vsub.f32 1.5, %v670_v59 }
 0x57e   :  { %v672_v61 = vmul.f32 %v1261_v56, %v671_v35 }
 0x580   :  { %v676_v60 = vsel %vm675_vm8, %v1261_v56, %v672_v61 }
 0x581   :  { %v684_v62 = vmul.f32 %v676_v60, %v1615_v4  ;;  %v1671_v4 = vld [vmem:[%s1884_s0] sm:$0xff] }
 0x583   :  { %v693_v1 = vmul.f32 %v1624_v57, %v684_v62  ;;  %v755_v18 = vpop.f32.mrf.mxu0  ;;  %v1678_v57 = vld [vmem:[%s1884_s0 + $0x8] sm:$0xff] }
 0x585   :  { %v702_v2 = vadd.f32 %v1630_v30, %v693_v1  ;;  %v1685_v30 = vld [vmem:[%s1884_s0 + $0x10] sm:$0xff] }
 0x587   :  { %v710_v3 = vmax.f32 %v702_v2, 0.0 }
 0x589   :  { %1189 = vmatmul.msk.f32.gmra.mxu0 %vm51_vm0, %v710_v3 }
 0x58b   :  { %v758_v19 = vpop.f32.mrf.mxu0 }
 0x593   :  { %v761_v20 = vpop.f32.mrf.mxu0 }
 0x59b   :  { %v764_v21 = vpop.f32.mrf.mxu0 }
 0x5a3   :  { %v767_v48 = vpop.f32.mrf.mxu0 }
 0x5ab   :  { %v770_v22 = vpop.f32.mrf.mxu0 }
 0x5b3   :  { %v773_v63 = vpop.f32.mrf.mxu0 }
 0x606   :  { %v776_v23 = vpop.f32.mrf.mxu0 }
 0x607   :  { %789 = vmatpush.msrb.mxu2 %v776_v23 }
 0x609   :  { %790 = vmatpush.msrb.mxu2 %v773_v63 }
 0x60b   :  { %791 = vmatpush.msrb.mxu2 %v770_v22 }
 0x60d   :  { %792 = vmatpush.msrb.mxu2 %v767_v48 }
 0x60f   :  { %793 = vmatpush.msrb.mxu2 %v764_v21 }
 0x611   :  { %794 = vmatpush.msrb.mxu2 %v761_v20 }
 0x613   :  { %795 = vmatpush.msrb.mxu2 %v758_v19 }
 0x615   :  { %796 = vmatpush.msrb.mxu2 %v755_v18 }
 0x616   :  { %1190 = vmatmul.msk.f32.vlgmr.msrb.gmra.mxu2 %vm119_vm1, %v1671_v4 }
 0x61e   :  { %1191 = vmatmul.msk.f32.gmra.mxu2 %vm119_vm1, %v1678_v57 }
 0x626   :  { %1192 = vmatmul.msk.f32.gmra.mxu2 %vm119_vm1, %v1685_v30 }
 0x62e   :  { %1193 = vmatmul.msk.f32.gmra.mxu2 %vm119_vm1, %v1692_v41 }
 0x636   :  { %1194 = vmatmul.msk.f32.gmra.mxu2 %vm119_vm1, %v1699_v24 }
 0x63e   :  { %1195 = vmatmul.msk.f32.gmra.mxu2 %vm119_vm1, %v1706_v25 }
 0x646   :  { %1196 = vmatmul.msk.f32.gmra.mxu2 %vm119_vm1, %v1713_v5 }
 0x64e   :  { %1197 = vmatmul.msk.f32.gmra.mxu2 %vm119_vm1, %v1720_v7 }
 0x699   :  { %v798_v9 = vpop.f32.mrf.mxu2 }
 0x69a   :  { %v799_v10 = vadd.f32 %v1224_v8, %v798_v9 }
 0x69c   :  { %v824_v12 = vsel %vm51_vm0, %v799_v10, 0.0 }
 0x69d   :  { %825 = vadd.xlane.f32.xlu2 %v824_v12 }
 0x6a1   :  { %v801_v11 = vpop.f32.mrf.mxu2 }
 0x6a2   :  { %v802_v13 = vadd.f32 %v1224_v8, %v801_v11 }
 0x6a4   :  { %v827_v14 = vsel %vm51_vm0, %v802_v13, 0.0 }
 0x6a5   :  { %828 = vadd.xlane.f32.xlu0 %v827_v14  ;;  %v1027_v14 = vld [vmem:[#allocation2 + $0x30] sm:$0xff] }
 0x6a9   :  { %v804_v15 = vpop.f32.mrf.mxu2 }
 0x6aa   :  { %v805_v17 = vadd.f32 %v1224_v8, %v804_v15 }
 0x6ac   :  { %v830_v44 = vsel %vm51_vm0, %v805_v17, 0.0 }
 0x6ad   :  { %831 = vadd.xlane.f32.xlu1 %v830_v44 }
 0x6b1   :  { %v807_v26 = vpop.f32.mrf.mxu2 }
 0x6b2   :  { %v808_v28 = vadd.f32 %v1224_v8, %v807_v26 }
 0x6b4   :  { %v833_v31 = vsel %vm51_vm0, %v808_v28, 0.0 }
 0x6b5   :  { %834 = vadd.xlane.f32.xlu2 %v833_v31 }
 0x6b9   :  { %v810_v32 = vpop.f32.mrf.mxu2 }
 0x6ba   :  { %v811_v33 = vadd.f32 %v1224_v8, %v810_v32 }
 0x6bc   :  { %v836_v16 = vsel %vm51_vm0, %v811_v33, 0.0 }
 0x6bd   :  { %837 = vadd.xlane.f32.xlu0 %v836_v16 }
 0x6c1   :  { %v813_v36 = vpop.f32.mrf.mxu2 }
 0x6c2   :  { %v814_v37 = vadd.f32 %v1224_v8, %v813_v36 }
 0x6c4   :  { %v839_v38 = vsel %vm51_vm0, %v814_v37, 0.0 }
 0x6c5   :  { %840 = vadd.xlane.f32.xlu1 %v839_v38 }
 0x6c9   :  { %v816_v39 = vpop.f32.mrf.mxu2 }
 0x6ca   :  { %v817_v40 = vadd.f32 %v1224_v8, %v816_v39 }
 0x6cc   :  { %v842_v27 = vsel %vm51_vm0, %v817_v40, 0.0 }
 0x6cd   :  { %843 = vadd.xlane.f32.xlu0 %v842_v27 }
 0x6d1   :  { %v819_v43 = vpop.f32.mrf.mxu2 }
 0x6d2   :  { %v820_v49 = vadd.f32 %v1224_v8, %v819_v43 }
 0x6d4   :  { %v845_v52 = vsel %vm51_vm0, %v820_v49, 0.0 }
 0x710   :  { %v826_v50 = vpop.xlane.xlu2 %825 }
 0x711   :  { %v848_v42 = vmul.f32 %v826_v50, %v1442_v54 }
 0x713   :  { %v1735_v29 = vsub.f32 %v799_v10, %v848_v42 }
 0x715   :  { %v864_v0 = vmul.f32 %v1735_v29, %v1735_v29 }
 0x717   :  { %v872_v45 = vsel %vm51_vm0, %v864_v0, 0.0 }
 0x718   :  { %v829_v46 = vpop.xlane.xlu0 %828  ;;  %873 = vadd.xlane.f32.xlu2 %v872_v45 }
 0x719   :  { %v849_v47 = vmul.f32 %v829_v46, %v1442_v54 }
 0x71b   :  { %v1741_v55 = vsub.f32 %v802_v13, %v849_v47  ;;  %v1028_v13 = vld [vmem:[#allocation2 + $0x38] sm:$0xff] }
 0x71c   :  { %1067 = vmatpush.msrb.mxu1 %v1028_v13 }
 0x71d   :  { %v865_v51 = vmul.f32 %v1741_v55, %v1741_v55 }
 0x71e   :  { %1068 = vmatpush.msrb.mxu1 %v1027_v14 }
 0x71f   :  { %v875_v34 = vsel %vm51_vm0, %v865_v51, 0.0 }
 0x720   :  { %v832_v53 = vpop.xlane.xlu1 %831  ;;  %876 = vadd.xlane.f32.xlu1 %v875_v34  ;;  %846 = vadd.xlane.f32.xlu2 %v845_v52 }
 0x721   :  { %v850_v56 = vmul.f32 %v832_v53, %v1442_v54  ;;  %v1795_v53 = vld [vmem:[%s1887_s3 + $0x8] ss:$0 sm:$0xff] }
 0x723   :  { %v1748_v58 = vsub.f32 %v805_v17, %v850_v56 }
 0x725   :  { %v866_v6 = vmul.f32 %v1748_v58, %v1748_v58 }
 0x727   :  { %v878_v59 = vsel %vm51_vm0, %v866_v6, 0.0 }
 0x728   :  { %879 = vadd.xlane.f32.xlu0 %v878_v59  ;;  %v835_v35 = vpop.xlane.xlu2 %834 }
 0x729   :  { %v851_v61 = vmul.f32 %v835_v35, %v1442_v54 }
 0x72b   :  { %v1754_v60 = vsub.f32 %v808_v28, %v851_v61 }
 0x72d   :  { %v867_v62 = vmul.f32 %v1754_v60, %v1754_v60 }
 0x72f   :  { %v881_v1 = vsel %vm51_vm0, %v867_v62, 0.0 }
 0x730   :  { %v838_v2 = vpop.xlane.xlu0 %837  ;;  %882 = vadd.xlane.f32.xlu1 %v881_v1 }
 0x731   :  { %v852_v3 = vmul.f32 %v838_v2, %v1442_v54 }
 0x733   :  { %v1760_v18 = vsub.f32 %v811_v33, %v852_v3 }
 0x735   :  { %v868_v19 = vmul.f32 %v1760_v18, %v1760_v18 }
 0x737   :  { %v884_v20 = vsel %vm51_vm0, %v868_v19, 0.0 }
 0x738   :  { %v841_v21 = vpop.xlane.xlu1 %840  ;;  %885 = vadd.xlane.f32.xlu2 %v884_v20 }
 0x739   :  { %v853_v48 = vmul.f32 %v841_v21, %v1442_v54 }
 0x73b   :  { %v1766_v22 = vsub.f32 %v814_v37, %v853_v48 }
 0x73d   :  { %v869_v63 = vmul.f32 %v1766_v22, %v1766_v22 }
 0x73f   :  { %v887_v23 = vsel %vm51_vm0, %v869_v63, 0.0 }
 0x740   :  { %888 = vadd.xlane.f32.xlu0 %v887_v23  ;;  %v844_v8 = vpop.xlane.xlu0 %843 }
 0x741   :  { %v854_v9 = vmul.f32 %v844_v8, %v1442_v54 }
 0x743   :  { %v1772_v10 = vsub.f32 %v817_v40, %v854_v9 }
 0x745   :  { %v870_v12 = vmul.f32 %v1772_v10, %v1772_v10 }
 0x747   :  { %v890_v11 = vsel %vm51_vm0, %v870_v12, 0.0 }
 0x748   :  { %891 = vadd.xlane.f32.xlu1 %v890_v11 }
 0x78b   :  { %v874_v15 = vpop.xlane.xlu2 %873 }
 0x78c   :  { %v896_v17 = vmul.f32 %v874_v15, %v1442_v54 }
 0x78e   :  { %v904_v44 = vadd.f32 1e-05, %v896_v17 }
 0x790   :  { %1262 = vrsqrt.f32 %v904_v44  ;;  %vm918_vm10 = vweird.f32 %v904_v44 }
 0x793   :  { %v877_v26 = vpop.xlane.xlu1 %876  ;;  %v847_v28 = vpop.xlane.xlu2 %846 }
 0x794   :  { %v897_v31 = vmul.f32 %v877_v26, %v1442_v54  ;;  %v855_v32 = vmul.f32 %v847_v28, %v1442_v54 }
 0x796   :  { %v1263_v33 = vpop.eup %1262  ;;  %v905_v16 = vadd.f32 1e-05, %v897_v31  ;;  %v1780_v36 = vsub.f32 %v820_v49, %v855_v32  ;;  %v1789_v49 = vld [vmem:[%s1887_s3 + $0x7] ss:$0 sm:$0xff] }
 0x797   :  { %v913_v37 = vmul.f32 %v1263_v33, %v904_v44  ;;  %vm919_vm9 = vweird.f32 %v1263_v33 }
 0x798   :  { %1264 = vrsqrt.f32 %v905_v16  ;;  %v871_v38 = vmul.f32 %v1780_v36, %v1780_v36  ;;  %vm920_vm11 = vmor %vm918_vm10, %vm919_vm9  ;;  %vm928_vm13 = vweird.f32 %v905_v16 }
 0x799   :  { %v914_v39 = vmul.f32 %v1263_v33, %v913_v37 }
 0x79a   :  { %v893_v40 = vsel %vm51_vm0, %v871_v38, 0.0 }
 0x79b   :  { %v915_v27 = vmul.f32 0.5, %v914_v39  ;;  %v880_v50 = vpop.xlane.xlu0 %879  ;;  %894 = vadd.xlane.f32.xlu2 %v893_v40 }
 0x79c   :  { %v898_v42 = vmul.f32 %v880_v50, %v1442_v54 }
 0x79d   :  { %v916_v0 = vsub.f32 1.5, %v915_v27 }
 0x79e   :  { %v1265_v43 = vpop.eup %1264  ;;  %v906_v45 = vadd.f32 1e-05, %v898_v42 }
 0x79f   :  { %v917_v46 = vmul.f32 %v1263_v33, %v916_v0  ;;  %v923_v47 = vmul.f32 %v1265_v43, %v905_v16  ;;  %vm929_vm12 = vweird.f32 %v1265_v43 }
 0x7a0   :  { %1266 = vrsqrt.f32 %v906_v45  ;;  %vm930_vm14 = vmor %vm928_vm13, %vm929_vm12  ;;  %vm938_vm2 = vweird.f32 %v906_v45 }
 0x7a1   :  { %v921_v51 = vsel %vm920_vm11, %v1263_v33, %v917_v46  ;;  %v924_v52 = vmul.f32 %v1265_v43, %v923_v47 }
 0x7a2   :  { %v992_v34 = vmul.f32 %v921_v51, %v1735_v29 }
 0x7a3   :  { %v925_v56 = vmul.f32 0.5, %v924_v52  ;;  %v883_v6 = vpop.xlane.xlu1 %882 }
 0x7a4   :  { %v899_v59 = vmul.f32 %v883_v6, %v1442_v54  ;;  %v1001_v35 = vmul.f32 %v1789_v49, %v992_v34 }
 0x7a5   :  { %v926_v61 = vsub.f32 1.5, %v925_v56 }
 0x7a6   :  { %v1267_v62 = vpop.eup %1266  ;;  %v907_v1 = vadd.f32 1e-05, %v899_v59  ;;  %v1010_v2 = vadd.f32 %v1795_v53, %v1001_v35 }
 0x7a7   :  { %v927_v3 = vmul.f32 %v1265_v43, %v926_v61  ;;  %v933_v29 = vmul.f32 %v1267_v62, %v906_v45  ;;  %vm939_vm15 = vweird.f32 %v1267_v62 }
 0x7a8   :  { %1268 = vrsqrt.f32 %v907_v1  ;;  %v1018_v19 = vmax.f32 %v1010_v2, 0.0  ;;  %vm940_vm3 = vmor %vm938_vm2, %vm939_vm15  ;;  %vm948_vm5 = vweird.f32 %v907_v1 }
 0x7a9   :  { %v931_v20 = vsel %vm930_vm14, %v1265_v43, %v927_v3  ;;  %v934_v21 = vmul.f32 %v1267_v62, %v933_v29 }
 0x7aa   :  { %1198 = vmatmul.msk.f32.vlgmr.msrb.gmra.mxu1 %vm51_vm0, %v1018_v19  ;;  %v993_v48 = vmul.f32 %v931_v20, %v1741_v55 }
 0x7ab   :  { %v935_v63 = vmul.f32 0.5, %v934_v21  ;;  %v886_v23 = vpop.xlane.xlu2 %885 }
 0x7ac   :  { %v900_v8 = vmul.f32 %v886_v23, %v1442_v54  ;;  %v1002_v9 = vmul.f32 %v1789_v49, %v993_v48 }
 0x7ad   :  { %v936_v12 = vsub.f32 1.5, %v935_v63 }
 0x7ae   :  { %v1269_v11 = vpop.eup %1268  ;;  %v908_v13 = vadd.f32 1e-05, %v900_v8  ;;  %v1011_v14 = vadd.f32 %v1795_v53, %v1002_v9 }
 0x7af   :  { %v937_v15 = vmul.f32 %v1267_v62, %v936_v12  ;;  %v943_v17 = vmul.f32 %v1269_v11, %v907_v1  ;;  %vm949_vm4 = vweird.f32 %v1269_v11 }
 0x7b0   :  { %1270 = vrsqrt.f32 %v908_v13  ;;  %v1019_v44 = vmax.f32 %v1011_v14, 0.0  ;;  %vm950_vm6 = vmor %vm948_vm5, %vm949_vm4  ;;  %vm958_vm8 = vweird.f32 %v908_v13 }
 0x7b1   :  { %v941_v26 = vsel %vm940_vm3, %v1267_v62, %v937_v15  ;;  %v944_v55 = vmul.f32 %v1269_v11, %v943_v17 }
 0x7b2   :  { %1199 = vmatmul.msk.f32.gmra.mxu1 %vm51_vm0, %v1019_v44  ;;  %v994_v28 = vmul.f32 %v941_v26, %v1748_v58 }
 0x7b3   :  { %v945_v31 = vmul.f32 0.5, %v944_v55  ;;  %v889_v32 = vpop.xlane.xlu0 %888 }
 0x7b4   :  { %v901_v33 = vmul.f32 %v889_v32, %v1442_v54  ;;  %v1003_v16 = vmul.f32 %v1789_v49, %v994_v28 }
 0x7b5   :  { %v946_v37 = vsub.f32 1.5, %v945_v31 }
 0x7b6   :  { %v1271_v38 = vpop.eup %1270  ;;  %v909_v39 = vadd.f32 1e-05, %v901_v33  ;;  %v1012_v40 = vadd.f32 %v1795_v53, %v1003_v16 }
 0x7b7   :  { %v947_v27 = vmul.f32 %v1269_v11, %v946_v37  ;;  %v953_v50 = vmul.f32 %v1271_v38, %v908_v13  ;;  %vm959_vm7 = vweird.f32 %v1271_v38 }
 0x7b8   :  { %1272 = vrsqrt.f32 %v909_v39  ;;  %v1020_v42 = vmax.f32 %v1012_v40, 0.0  ;;  %vm960_vm9 = vmor %vm958_vm8, %vm959_vm7  ;;  %vm968_vm11 = vweird.f32 %v909_v39 }
 0x7b9   :  { %v951_v0 = vsel %vm950_vm6, %v1269_v11, %v947_v27  ;;  %v954_v58 = vmul.f32 %v1271_v38, %v953_v50 }
 0x7ba   :  { %1200 = vmatmul.msk.f32.gmra.mxu1 %vm51_vm0, %v1020_v42  ;;  %v995_v43 = vmul.f32 %v951_v0, %v1754_v60 }
 0x7bb   :  { %v955_v45 = vmul.f32 0.5, %v954_v58  ;;  %v892_v46 = vpop.xlane.xlu1 %891 }
 0x7bc   :  { %v902_v47 = vmul.f32 %v892_v46, %v1442_v54  ;;  %v1004_v51 = vmul.f32 %v1789_v49, %v995_v43 }
 0x7bd   :  { %v956_v52 = vsub.f32 1.5, %v955_v45 }
 0x7be   :  { %v1273_v34 = vpop.eup %1272  ;;  %v910_v56 = vadd.f32 1e-05, %v902_v47  ;;  %v1013_v6 = vadd.f32 %v1795_v53, %v1004_v51 }
 0x7bf   :  { %v957_v59 = vmul.f32 %v1271_v38, %v956_v52  ;;  %v963_v35 = vmul.f32 %v1273_v34, %v909_v39  ;;  %vm969_vm10 = vweird.f32 %v1273_v34 }
 0x7c0   :  { %1274 = vrsqrt.f32 %v910_v56  ;;  %v1021_v61 = vmax.f32 %v1013_v6, 0.0  ;;  %vm970_vm12 = vmor %vm968_vm11, %vm969_vm10  ;;  %vm978_vm14 = vweird.f32 %v910_v56 }
 0x7c1   :  { %v961_v62 = vsel %vm960_vm9, %v1271_v38, %v957_v59  ;;  %v964_v60 = vmul.f32 %v1273_v34, %v963_v35 }
 0x7c2   :  { %1201 = vmatmul.msk.f32.gmra.mxu1 %vm51_vm0, %v1021_v61  ;;  %v996_v1 = vmul.f32 %v961_v62, %v1760_v18 }
 0x7c3   :  { %v965_v2 = vmul.f32 0.5, %v964_v60 }
 0x7c4   :  { %v1005_v3 = vmul.f32 %v1789_v49, %v996_v1 }
 0x7c5   :  { %v966_v29 = vsub.f32 1.5, %v965_v2 }
 0x7c6   :  { %v1275_v19 = vpop.eup %1274  ;;  %v1014_v20 = vadd.f32 %v1795_v53, %v1005_v3 }
 0x7c7   :  { %v967_v21 = vmul.f32 %v1273_v34, %v966_v29  ;;  %v973_v48 = vmul.f32 %v1275_v19, %v910_v56  ;;  %vm979_vm13 = vweird.f32 %v1275_v19 }
 0x7c8   :  { %v1022_v63 = vmax.f32 %v1014_v20, 0.0  ;;  %vm980_vm15 = vmor %vm978_vm14, %vm979_vm13 }
 0x7c9   :  { %v971_v23 = vsel %vm970_vm12, %v1273_v34, %v967_v21  ;;  %v974_v8 = vmul.f32 %v1275_v19, %v973_v48 }
 0x7ca   :  { %1202 = vmatmul.msk.f32.gmra.mxu1 %vm51_vm0, %v1022_v63  ;;  %v997_v9 = vmul.f32 %v971_v23, %v1766_v22 }
 0x7cb   :  { %v975_v18 = vmul.f32 0.5, %v974_v8 }
 0x7cc   :  { %v1006_v12 = vmul.f32 %v1789_v49, %v997_v9 }
 0x7cd   :  { %v976_v11 = vsub.f32 1.5, %v975_v18 }
 0x7ce   :  { %v1015_v13 = vadd.f32 %v1795_v53, %v1006_v12 }
 0x7cf   :  { %v977_v14 = vmul.f32 %v1275_v19, %v976_v11 }
 0x7d0   :  { %v1023_v15 = vmax.f32 %v1015_v13, 0.0 }
 0x7d1   :  { %v981_v17 = vsel %vm980_vm15, %v1275_v19, %v977_v14 }
 0x7d2   :  { %1203 = vmatmul.msk.f32.gmra.mxu1 %vm51_vm0, %v1023_v15  ;;  %v998_v44 = vmul.f32 %v981_v17, %v1772_v10 }
 0x7d4   :  { %v1007_v26 = vmul.f32 %v1789_v49, %v998_v44 }
 0x7d6   :  { %v1016_v22 = vadd.f32 %v1795_v53, %v1007_v26 }
 0x7d8   :  { %v1024_v55 = vmax.f32 %v1016_v22, 0.0 }
 0x7da   :  { %1204 = vmatmul.msk.f32.gmra.mxu1 %vm51_vm0, %v1024_v55 }
 0x80e   :  { %v895_v28 = vpop.xlane.xlu2 %894 }
 0x80f   :  { %v903_v31 = vmul.f32 %v895_v28, %v1442_v54 }
 0x811   :  { %v911_v32 = vadd.f32 1e-05, %v903_v31 }
 0x813   :  { %1276 = vrsqrt.f32 %v911_v32  ;;  %vm988_vm3 = vweird.f32 %v911_v32 }
 0x819   :  { %v1277_v33 = vpop.eup %1276 }
 0x81a   :  { %v983_v16 = vmul.f32 %v1277_v33, %v911_v32  ;;  %vm989_vm2 = vweird.f32 %v1277_v33 }
 0x81b   :  { %vm990_vm4 = vmor %vm988_vm3, %vm989_vm2 }
 0x81c   :  { %v984_v37 = vmul.f32 %v1277_v33, %v983_v16 }
 0x81e   :  { %v985_v38 = vmul.f32 0.5, %v984_v37 }
 0x820   :  { %v986_v39 = vsub.f32 1.5, %v985_v38 }
 0x822   :  { %v987_v40 = vmul.f32 %v1277_v33, %v986_v39 }
 0x824   :  { %v991_v10 = vsel %vm990_vm4, %v1277_v33, %v987_v40 }
 0x825   :  { %v999_v27 = vmul.f32 %v991_v10, %v1780_v36 }
 0x827   :  { %v1008_v50 = vmul.f32 %v1789_v49, %v999_v27  ;;  %v1070_v54 = vpop.f32.mrf.mxu1 }
 0x829   :  { %v1017_v42 = vadd.f32 %v1795_v53, %v1008_v50 }
 0x82b   :  { %v1025_v0 = vmax.f32 %v1017_v42, 0.0 }
 0x82d   :  { %1205 = vmatmul.msk.f32.gmra.mxu1 %vm51_vm0, %v1025_v0 }
 0x82f   :  { %v1073_v58 = vpop.f32.mrf.mxu1 }
 0x837   :  { %v1076_v43 = vpop.f32.mrf.mxu1 }
 0x83f   :  { %v1079_v45 = vpop.f32.mrf.mxu1 }
 0x847   :  { %v1082_v46 = vpop.f32.mrf.mxu1 }
 0x84f   :  { %v1085_v47 = vpop.f32.mrf.mxu1 }
 0x857   :  { %v1088_v51 = vpop.f32.mrf.mxu1 }
 0x8aa   :  { %v1091_v52 = vpop.f32.mrf.mxu1 }
 0x8ab   :  { %1104 = vmatpush.msrb.mxu3 %v1091_v52 }
 0x8ad   :  { %1105 = vmatpush.msrb.mxu3 %v1088_v51 }
 0x8af   :  { %1106 = vmatpush.msrb.mxu3 %v1085_v47 }
 0x8b1   :  { %1107 = vmatpush.msrb.mxu3 %v1082_v46 }
 0x8b3   :  { %1108 = vmatpush.msrb.mxu3 %v1079_v45 }
 0x8b5   :  { %1109 = vmatpush.msrb.mxu3 %v1076_v43 }
 0x8b7   :  { %1110 = vmatpush.msrb.mxu3 %v1073_v58 }
 0x8b9   :  { %1111 = vmatpush.msrb.mxu3 %v1070_v54 }
 0x8ba   :  { %1206 = vmatmul.msk.f32.vlgmr.msrb.gmra.mxu3 %vm119_vm1, %v1671_v4  ;;  %v1227_v4 = vld [vmem:[%s1887_s3 + $0x9] ss:$0 sm:$0xff] }
 0x8c2   :  { %1207 = vmatmul.msk.f32.gmra.mxu3 %vm119_vm1, %v1678_v57 }
 0x8ca   :  { %1208 = vmatmul.msk.f32.gmra.mxu3 %vm119_vm1, %v1685_v30 }
 0x8d2   :  { %1209 = vmatmul.msk.f32.gmra.mxu3 %vm119_vm1, %v1692_v41 }
 0x8da   :  { %1210 = vmatmul.msk.f32.gmra.mxu3 %vm119_vm1, %v1699_v24 }
 0x8e2   :  { %1211 = vmatmul.msk.f32.gmra.mxu3 %vm119_vm1, %v1706_v25 }
 0x8ea   :  { %1212 = vmatmul.msk.f32.gmra.mxu3 %vm119_vm1, %v1713_v5 }
 0x8f2   :  { %1213 = vmatmul.msk.f32.gmra.mxu3 %vm119_vm1, %v1720_v7 }
 0x93d   :  { %v1113_v57 = vpop.f32.mrf.mxu3 }
 0x93e   :  { %v1114_v30 = vadd.f32 %v1227_v4, %v1113_v57 }
 0x940   :  { %1137 = vst.msk [vmem:[%s1888_s4] sm:$0xff] %vm51_vm0, %v1114_v30 }
 0x945   :  { %v1116_v41 = vpop.f32.mrf.mxu3 }
 0x946   :  { %v1117_v24 = vadd.f32 %v1227_v4, %v1116_v41 }
 0x948   :  { %1138 = vst.msk [vmem:[%s1888_s4 + $0x8] sm:$0xff] %vm51_vm0, %v1117_v24 }
 0x94d   :  { %v1119_v25 = vpop.f32.mrf.mxu3 }
 0x94e   :  { %v1120_v5 = vadd.f32 %v1227_v4, %v1119_v25 }
 0x950   :  { %1139 = vst.msk [vmem:[%s1888_s4 + $0x10] sm:$0xff] %vm51_vm0, %v1120_v5 }
 0x955   :  { %v1122_v7 = vpop.f32.mrf.mxu3 }
 0x956   :  { %v1123_v36 = vadd.f32 %v1227_v4, %v1122_v7 }
 0x958   :  { %1140 = vst.msk [vmem:[%s1888_s4 + $0x18] sm:$0xff] %vm51_vm0, %v1123_v36 }
 0x95d   :  { %v1125_v49 = vpop.f32.mrf.mxu3 }
 0x95e   :  { %v1126_v53 = vadd.f32 %v1227_v4, %v1125_v49 }
 0x960   :  { %1141 = vst.msk [vmem:[%s1888_s4 + $0x20] sm:$0xff] %vm51_vm0, %v1126_v53 }
 0x965   :  { %v1128_v34 = vpop.f32.mrf.mxu3 }
 0x966   :  { %v1129_v56 = vadd.f32 %v1227_v4, %v1128_v34 }
 0x968   :  { %1142 = vst.msk [vmem:[%s1888_s4 + $0x28] sm:$0xff] %vm51_vm0, %v1129_v56 }
 0x96d   :  { %v1131_v6 = vpop.f32.mrf.mxu3 }
 0x96e   :  { %v1132_v59 = vadd.f32 %v1227_v4, %v1131_v6 }
 0x970   :  { %1143 = vst.msk [vmem:[%s1888_s4 + $0x30] sm:$0xff] %vm51_vm0, %v1132_v59 }
 0x975   :  { %v1134_v35 = vpop.f32.mrf.mxu3 }
 0x976   :  { %v1135_v61 = vadd.f32 %v1227_v4, %v1134_v35 }
 0x978   :  { %1144 = vst.msk [vmem:[%s1888_s4 + $0x38] sm:$0xff] %vm51_vm0, %v1135_v61 }
 0x979   :  { %1149 = vsyncpa [#allocation3], 1 }

</bundles_post_ra>
